<compile_context>
chip_gen: v7x
topology: tpu7x:2x2x1
jax: 0.10.0
libtpu: 0.0.40
codegen_flags: <defaults>
</compile_context>

<pallas_src>
import math

import jax
import jax.numpy as jnp
from jax.experimental import pallas as pl
from jax.experimental.pallas import tpu as pltpu


def _group_sum(v, n_feat, width):
    """Sum over the n_feat (H) axis for every (channel, width) group of a
    flattened (C, n_feat*width) slab; the result is broadcast back to every
    lane of its group.  Lanes q, q' belong to the same group iff
    q == q' (mod width), so cyclic rotations by multiples of `width` permute
    lanes within groups only.  Rotate-and-add is direction-agnostic, so the
    roll sign convention does not matter."""
    total = n_feat * width
    s = v
    if n_feat & (n_feat - 1) == 0:            # power of two: log2(n_feat) rolls
        step = width
        while step < total:
            s = s + pltpu.roll(s, step, axis=1)
            step *= 2
    else:                                     # general n_feat: n_feat-1 rolls
        cur = v
        for _ in range(n_feat - 1):
            cur = pltpu.roll(cur, width, axis=1)
            s = s + cur
    return s


def _layernorm_gelu_flat(v, gamma, beta, n_feat, width, eps=1e-5):
    """LayerNorm over the n_feat (H) axis of a flattened (C, H*W) slab,
    followed by exact (erf) GELU — matches nn.LayerNorm + F.gelu."""
    inv_n = 1.0 / n_feat
    mean = _group_sum(v, n_feat, width) * inv_n
    d = v - mean
    var = _group_sum(d * d, n_feat, width) * inv_n        # biased variance
    normed = d * jax.lax.rsqrt(var + eps)
    normed = normed * gamma + beta                        # gamma/beta: (1, H*W)
    return 0.5 * normed * (1.0 + jax.lax.erf(normed * (1.0 / math.sqrt(2.0))))


def _make_kernel(c_in, h, w, k, ml):
    """Kernel for one batch element of the flattened (C, H*W) slab."""
    hw = h * w
    p = k // 2
    # Flat-index offset of each conv tap (dy, dx): (dy-p)*W + (dx-p).
    shifts = [(dy - p) * w + (dx - p) for dy in range(k) for dx in range(k)]

    def kernel(x_ref, g1_ref, b1_ref, w1_ref, c1b_ref,
               g2_ref, b2_ref, w2_ref, c2b_ref, mask_ref,
               out_ref, padf_ref, col_ref):
        # x_ref: (C, H*W) VMEM tile for one batch element (lane-dense).
        # wN_ref: (C_out, K*K*C_in) VMEM weight tile, cNb_ref: (C_out, 1).
        # mask_ref: (K*K, H*W) border-validity masks (1 = tap in bounds).
        # padf_ref: (C, ML + H*W + max_shift) flat padded scratch.
        # col_ref:  (K*K*C_in, H*W) im2col activation matrix.

        def conv2d(v, w_mat_ref, bias_ref):
            # Place the slab at a 128-aligned lane offset inside the flat
            # padded scratch; the margins are only ever read on lanes whose
            # mask is 0 (jnp.where selects them away), so no zero fill needed.
            padf_ref[:, ml:ml + hw] = v
            for t, s in enumerate(shifts):
                tap = padf_ref[:, ml + s:ml + s + hw]            # (C, H*W)
                valid = mask_ref[t:t + 1, :] != 0.0              # (1, H*W)
                col_ref[t * c_in:(t + 1) * c_in, :] = jnp.where(valid, tap, 0.0)
            # One MXU matmul per conv; bias added once as a column.
            out = jnp.dot(w_mat_ref[...], col_ref[...],
                          preferred_element_type=jnp.float32)    # (C_out, H*W)
            return out + bias_ref[...]

        x = x_ref[...].astype(jnp.float32)                       # residual
        hbuf = _layernorm_gelu_flat(x, g1_ref[...], b1_ref[...], h, w)
        # TODO(synk): dropout1 implemented as identity (inference-mode forward).
        hbuf = conv2d(hbuf, w1_ref, c1b_ref)
        hbuf = _layernorm_gelu_flat(hbuf, g2_ref[...], b2_ref[...], h, w)
        # TODO(synk): dropout2 implemented as identity (inference-mode forward).
        hbuf = conv2d(hbuf, w2_ref, c2b_ref)
        out_ref[...] = (hbuf + x).astype(out_ref.dtype)

    return kernel


def residual_cnn_forward(x, params):
    """x: (B, C, H=n_feat, W) float32.  params = (g1, b1, w1, c1b, g2, b2, w2, c2b)."""
    g1, b1, w1, c1b, g2, b2, w2, c2b = params
    B, C, H, W = x.shape
    C_out, C_in, K, _ = w1.shape
    assert C_in == C and C_out == C, "residual add requires in == out channels"
    assert K % 2 == 1, "padding=K//2 matches the reference only for odd K"
    HW = H * W
    p = K // 2
    max_shift = p * W + p
    ML = ((max_shift + 127) // 128) * 128     # lane-aligned left margin

    kernel = _make_kernel(C_in, H, W, K, ML)

    # ---- wrapper-side layout plumbing (free reshapes / tiny constants) ----
    xf = x.reshape(B, C, HW)                                     # lane-dense
    # LayerNorm params broadcast over width: gamma_flat[q] = gamma[q // W].
    g1f = jnp.repeat(g1, W).reshape(1, HW)
    b1f = jnp.repeat(b1, W).reshape(1, HW)
    g2f = jnp.repeat(g2, W).reshape(1, HW)
    b2f = jnp.repeat(b2, W).reshape(1, HW)
    # (C_out, K*K*C_in) weight tiles, tap-major / channel-minor, kept in VMEM.
    w1m = jnp.transpose(w1, (0, 2, 3, 1)).reshape(C_out, K * K * C_in)
    w2m = jnp.transpose(w2, (0, 2, 3, 1)).reshape(C_out, K * K * C_in)
    b1c = c1b.reshape(C_out, 1)
    b2c = c2b.reshape(C_out, 1)
    # Border-validity masks for the K*K shifted views (1 = source in bounds).
    yy = jnp.arange(H).reshape(H, 1)
    xx = jnp.arange(W).reshape(1, W)
    masks = []
    for dy in range(K):
        for dx in range(K):
            oy, ox = dy - p, dx - p
            m = ((yy + oy >= 0) & (yy + oy < H) &
                 (xx + ox >= 0) & (xx + ox < W))
            masks.append(m.reshape(HW))
    maskf = jnp.stack(masks, axis=0).astype(jnp.float32)         # (K*K, H*W)

    x_spec = pl.BlockSpec((pl.Squeezed(), C, HW), lambda b: (b, 0, 0))

    def full(a):
        return pl.BlockSpec(a.shape, lambda b, _nd=a.ndim: (0,) * _nd)

    out = pl.pallas_call(
        kernel,
        out_shape=jax.ShapeDtypeStruct((B, C, HW), x.dtype),
        grid_spec=pltpu.PrefetchScalarGridSpec(
            num_scalar_prefetch=0,
            grid=(B,),
            in_specs=[x_spec,
                      full(g1f), full(b1f), full(w1m), full(b1c),
                      full(g2f), full(b2f), full(w2m), full(b2c),
                      full(maskf)],
            out_specs=x_spec,
            scratch_shapes=[
                pltpu.VMEM((C, ML + HW + max_shift), jnp.float32),  # flat padded slab
                pltpu.VMEM((K * K * C_in, HW), jnp.float32),        # im2col matrix
            ],
        ),
        compiler_params=pltpu.CompilerParams(
            dimension_semantics=("parallel",),
            vmem_limit_bytes=32 * 1024 * 1024,
        ),
    )(xf, g1f, b1f, w1m, b1c, g2f, b2f, w2m, b2c, maskf)

    return out.reshape(B, C, H, W)


def reference(x, params):
    """Pure-JAX reference matching the PyTorch forward (eval mode)."""
    g1, b1, w1, c1b, g2, b2, w2, c2b = params

    def ln_gelu(v, g, b):
        mean = v.mean(axis=2, keepdims=True)
        var = ((v - mean) ** 2).mean(axis=2, keepdims=True)
        n = (v - mean) / jnp.sqrt(var + 1e-5)
        n = n * g.reshape(1, 1, -1, 1) + b.reshape(1, 1, -1, 1)
        return jax.nn.gelu(n, approximate=False)

    def conv(v, w, bias):
        p = w.shape[2] // 2
        out = jax.lax.conv_general_dilated(
            v, w, window_strides=(1, 1), padding=[(p, p), (p, p)],
            dimension_numbers=("NCHW", "OIHW", "NCHW"))
        return out + bias.reshape(1, -1, 1, 1)

    h = ln_gelu(x, g1, b1)
    h = conv(h, w1, c1b)
    h = ln_gelu(h, g2, b2)
    h = conv(h, w2, c2b)
    return h + x


if __name__ == "__main__":
    key = jax.random.PRNGKey(0)
    B, C, n_feat, W, K = 2, 4, 16, 16, 3
    k0, k1, k2, k3, k4 = jax.random.split(key, 5)

    x = jax.random.normal(k0, (B, C, n_feat, W), jnp.float32)

    # Deterministic parameter init (shapes from ResidualCNN.__init__).
    g1 = jnp.ones((n_feat,), jnp.float32)
    b1 = jnp.zeros((n_feat,), jnp.float32)
    g2 = jnp.ones((n_feat,), jnp.float32)
    b2 = jnp.zeros((n_feat,), jnp.float32)
    w1 = 0.1 * jax.random.normal(k1, (C, C, K, K), jnp.float32)
    c1b = 0.1 * jax.random.normal(k2, (C,), jnp.float32)
    w2 = 0.1 * jax.random.normal(k3, (C, C, K, K), jnp.float32)
    c2b = 0.1 * jax.random.normal(k4, (C,), jnp.float32)
    params = (g1, b1, w1, c1b, g2, b2, w2, c2b)

    out = residual_cnn_forward(x, params)
    out = jax.block_until_ready(out)

    ref = reference(x, params)
    max_err = float(jnp.max(jnp.abs(out - ref)))
    assert out.shape == x.shape and out.dtype == x.dtype
    # Tolerance leaves headroom for MXU matmul rounding in the im2col conv vs.
    # the XLA convolution reference; any structural error (wrong tap/weight
    # ordering, shift, mask, or missing bias) is orders of magnitude larger.
    assert jnp.allclose(out, ref, atol=5e-3, rtol=5e-3), f"max_err={max_err}"
    print("KERNEL_OK")
</pallas_src>

<mosaic_0001>
module attributes {stable_mosaic.version = 11 : i64} {
  func.func @kernel(%arg0: i32, %arg1: memref<1x4x256xf32, #tpu.memory_space<vmem>>, %arg2: memref<1x256xf32, #tpu.memory_space<vmem>>, %arg3: memref<1x256xf32, #tpu.memory_space<vmem>>, %arg4: memref<4x36xf32, #tpu.memory_space<vmem>>, %arg5: memref<4x1xf32, #tpu.memory_space<vmem>>, %arg6: memref<1x256xf32, #tpu.memory_space<vmem>>, %arg7: memref<1x256xf32, #tpu.memory_space<vmem>>, %arg8: memref<4x36xf32, #tpu.memory_space<vmem>>, %arg9: memref<4x1xf32, #tpu.memory_space<vmem>>, %arg10: memref<9x256xf32, #tpu.memory_space<vmem>>, %arg11: memref<1x4x256xf32, #tpu.memory_space<vmem>>, %arg12: memref<4x401xf32, #tpu.memory_space<vmem>>, %arg13: memref<36x256xf32, #tpu.memory_space<vmem>>) attributes {dimension_semantics = [#tpu.dimension_semantics<parallel>], iteration_bounds = array<i64: 2>, scalar_prefetch = 0 : i64, scratch_operands = 2 : i64, tpu.core_type = #tpu.core_type<tc>, window_params = [{transform_indices = @transform_0, window_bounds = array<i64: 1, 4, 256>}, {pipeline_mode = #tpu.pipeline_mode<synchronous>, transform_indices = @transform_1, window_bounds = array<i64: 1, 256>}, {pipeline_mode = #tpu.pipeline_mode<synchronous>, transform_indices = @transform_2, window_bounds = array<i64: 1, 256>}, {pipeline_mode = #tpu.pipeline_mode<synchronous>, transform_indices = @transform_3, window_bounds = array<i64: 4, 36>}, {pipeline_mode = #tpu.pipeline_mode<synchronous>, transform_indices = @transform_4, window_bounds = array<i64: 4, 1>}, {pipeline_mode = #tpu.pipeline_mode<synchronous>, transform_indices = @transform_5, window_bounds = array<i64: 1, 256>}, {pipeline_mode = #tpu.pipeline_mode<synchronous>, transform_indices = @transform_6, window_bounds = array<i64: 1, 256>}, {pipeline_mode = #tpu.pipeline_mode<synchronous>, transform_indices = @transform_7, window_bounds = array<i64: 4, 36>}, {pipeline_mode = #tpu.pipeline_mode<synchronous>, transform_indices = @transform_8, window_bounds = array<i64: 4, 1>}, {pipeline_mode = #tpu.pipeline_mode<synchronous>, transform_indices = @transform_9, window_bounds = array<i64: 9, 256>}, {transform_indices = @transform_10, window_bounds = array<i64: 1, 4, 256>}]} {
    %c0 = arith.constant 0 : index
    %c0_0 = arith.constant 0 : index
    %c0_1 = arith.constant 0 : index
    %0 = vector.load %arg1[%c0, %c0_0, %c0_1] : memref<1x4x256xf32, #tpu.memory_space<vmem>>, vector<1x4x256xf32>
    %1 = vector.shape_cast %0 : vector<1x4x256xf32> to vector<4x256xf32>
    %c0_2 = arith.constant 0 : index
    %c0_3 = arith.constant 0 : index
    %2 = vector.load %arg2[%c0_2, %c0_3] : memref<1x256xf32, #tpu.memory_space<vmem>>, vector<1x256xf32>
    %c0_4 = arith.constant 0 : index
    %c0_5 = arith.constant 0 : index
    %3 = vector.load %arg3[%c0_4, %c0_5] : memref<1x256xf32, #tpu.memory_space<vmem>>, vector<1x256xf32>
    %c16_i32 = arith.constant 16 : i32
    %4 = tpu.dynamic_rotate %1 by %c16_i32 dim 1 : vector<4x256xf32>, i32 -> vector<4x256xf32>
    %5 = arith.addf %1, %4 : vector<4x256xf32>
    %c32_i32 = arith.constant 32 : i32
    %6 = tpu.dynamic_rotate %5 by %c32_i32 dim 1 : vector<4x256xf32>, i32 -> vector<4x256xf32>
    %7 = arith.addf %5, %6 : vector<4x256xf32>
    %c64_i32 = arith.constant 64 : i32
    %8 = tpu.dynamic_rotate %7 by %c64_i32 dim 1 : vector<4x256xf32>, i32 -> vector<4x256xf32>
    %9 = arith.addf %7, %8 : vector<4x256xf32>
    %c128_i32 = arith.constant 128 : i32
    %10 = tpu.dynamic_rotate %9 by %c128_i32 dim 1 : vector<4x256xf32>, i32 -> vector<4x256xf32>
    %11 = arith.addf %9, %10 : vector<4x256xf32>
    %cst = arith.constant 6.250000e-02 : f32
    %12 = vector.broadcast %cst : f32 to vector<4x256xf32>
    %13 = arith.mulf %11, %12 : vector<4x256xf32>
    %14 = arith.subf %1, %13 : vector<4x256xf32>
    %15 = arith.mulf %14, %14 : vector<4x256xf32>
    %c16_i32_6 = arith.constant 16 : i32
    %16 = tpu.dynamic_rotate %15 by %c16_i32_6 dim 1 : vector<4x256xf32>, i32 -> vector<4x256xf32>
    %17 = arith.addf %15, %16 : vector<4x256xf32>
    %c32_i32_7 = arith.constant 32 : i32
    %18 = tpu.dynamic_rotate %17 by %c32_i32_7 dim 1 : vector<4x256xf32>, i32 -> vector<4x256xf32>
    %19 = arith.addf %17, %18 : vector<4x256xf32>
    %c64_i32_8 = arith.constant 64 : i32
    %20 = tpu.dynamic_rotate %19 by %c64_i32_8 dim 1 : vector<4x256xf32>, i32 -> vector<4x256xf32>
    %21 = arith.addf %19, %20 : vector<4x256xf32>
    %c128_i32_9 = arith.constant 128 : i32
    %22 = tpu.dynamic_rotate %21 by %c128_i32_9 dim 1 : vector<4x256xf32>, i32 -> vector<4x256xf32>
    %23 = arith.addf %21, %22 : vector<4x256xf32>
    %cst_10 = arith.constant 6.250000e-02 : f32
    %24 = vector.broadcast %cst_10 : f32 to vector<4x256xf32>
    %25 = arith.mulf %23, %24 : vector<4x256xf32>
    %cst_11 = arith.constant 9.99999974E-6 : f32
    %26 = vector.broadcast %cst_11 : f32 to vector<4x256xf32>
    %27 = arith.addf %25, %26 : vector<4x256xf32>
    %28 = math.rsqrt %27 : vector<4x256xf32>
    %29 = arith.mulf %14, %28 : vector<4x256xf32>
    %30 = vector.broadcast %2 : vector<1x256xf32> to vector<4x256xf32>
    %31 = arith.mulf %29, %30 : vector<4x256xf32>
    %32 = vector.broadcast %3 : vector<1x256xf32> to vector<4x256xf32>
    %33 = arith.addf %31, %32 : vector<4x256xf32>
    %cst_12 = arith.constant 5.000000e-01 : f32
    %34 = vector.broadcast %cst_12 : f32 to vector<4x256xf32>
    %35 = arith.mulf %34, %33 : vector<4x256xf32>
    %cst_13 = arith.constant 0.707106769 : f32
    %36 = vector.broadcast %cst_13 : f32 to vector<4x256xf32>
    %37 = arith.mulf %33, %36 : vector<4x256xf32>
    %38 = math.erf %37 : vector<4x256xf32>
    %cst_14 = arith.constant 1.000000e+00 : f32
    %39 = vector.broadcast %cst_14 : f32 to vector<4x256xf32>
    %40 = arith.addf %39, %38 : vector<4x256xf32>
    %41 = arith.mulf %35, %40 : vector<4x256xf32>
    %c0_15 = arith.constant 0 : index
    %c128 = arith.constant 128 : index
    %42 = vector.load %arg12[%c0_15, %c128] : memref<4x401xf32, #tpu.memory_space<vmem>>, vector<4x256xf32>
    tpu.vector_store %arg12[%c0_15, %c128], %41 {strides = array<i32>} : memref<4x401xf32, #tpu.memory_space<vmem>>, vector<4x256xf32>,
    %c0_16 = arith.constant 0 : index
    %c111 = arith.constant 111 : index
    %43 = vector.load %arg12[%c0_16, %c111] : memref<4x401xf32, #tpu.memory_space<vmem>>, vector<4x256xf32>
    %c0_17 = arith.constant 0 : index
    %c0_18 = arith.constant 0 : index
    %44 = vector.load %arg10[%c0_17, %c0_18] : memref<9x256xf32, #tpu.memory_space<vmem>>, vector<1x256xf32>
    %cst_19 = arith.constant 0.000000e+00 : f32
    %45 = vector.broadcast %cst_19 : f32 to vector<1x256xf32>
    %46 = arith.cmpf one, %44, %45 : vector<1x256xf32>
    %cst_20 = arith.constant 0.000000e+00 : f32
    %47 = vector.shape_cast %46 : vector<1x256xi1> to vector<1x256xi1>
    %48 = vector.broadcast %47 : vector<1x256xi1> to vector<4x256xi1>
    %49 = vector.broadcast %cst_20 : f32 to vector<4x256xf32>
    %50 = arith.select %48, %43, %49 : vector<4x256xi1>, vector<4x256xf32>
    %c0_21 = arith.constant 0 : index
    %c0_22 = arith.constant 0 : index
    %51 = vector.load %arg13[%c0_21, %c0_22] : memref<36x256xf32, #tpu.memory_space<vmem>>, vector<4x256xf32>
    tpu.vector_store %arg13[%c0_21, %c0_22], %50 {strides = array<i32>} : memref<36x256xf32, #tpu.memory_space<vmem>>, vector<4x256xf32>,
    %c0_23 = arith.constant 0 : index
    %c112 = arith.constant 112 : index
    %52 = vector.load %arg12[%c0_23, %c112] : memref<4x401xf32, #tpu.memory_space<vmem>>, vector<4x256xf32>
    %c1 = arith.constant 1 : index
    %c0_24 = arith.constant 0 : index
    %53 = vector.load %arg10[%c1, %c0_24] : memref<9x256xf32, #tpu.memory_space<vmem>>, vector<1x256xf32>
    %cst_25 = arith.constant 0.000000e+00 : f32
    %54 = vector.broadcast %cst_25 : f32 to vector<1x256xf32>
    %55 = arith.cmpf one, %53, %54 : vector<1x256xf32>
    %cst_26 = arith.constant 0.000000e+00 : f32
    %56 = vector.shape_cast %55 : vector<1x256xi1> to vector<1x256xi1>
    %57 = vector.broadcast %56 : vector<1x256xi1> to vector<4x256xi1>
    %58 = vector.broadcast %cst_26 : f32 to vector<4x256xf32>
    %59 = arith.select %57, %52, %58 : vector<4x256xi1>, vector<4x256xf32>
    %c4 = arith.constant 4 : index
    %c0_27 = arith.constant 0 : index
    %60 = vector.load %arg13[%c4, %c0_27] : memref<36x256xf32, #tpu.memory_space<vmem>>, vector<4x256xf32>
    tpu.vector_store %arg13[%c4, %c0_27], %59 {strides = array<i32>} : memref<36x256xf32, #tpu.memory_space<vmem>>, vector<4x256xf32>,
    %c0_28 = arith.constant 0 : index
    %c113 = arith.constant 113 : index
    %61 = vector.load %arg12[%c0_28, %c113] : memref<4x401xf32, #tpu.memory_space<vmem>>, vector<4x256xf32>
    %c2 = arith.constant 2 : index
    %c0_29 = arith.constant 0 : index
    %62 = vector.load %arg10[%c2, %c0_29] : memref<9x256xf32, #tpu.memory_space<vmem>>, vector<1x256xf32>
    %cst_30 = arith.constant 0.000000e+00 : f32
    %63 = vector.broadcast %cst_30 : f32 to vector<1x256xf32>
    %64 = arith.cmpf one, %62, %63 : vector<1x256xf32>
    %cst_31 = arith.constant 0.000000e+00 : f32
    %65 = vector.shape_cast %64 : vector<1x256xi1> to vector<1x256xi1>
    %66 = vector.broadcast %65 : vector<1x256xi1> to vector<4x256xi1>
    %67 = vector.broadcast %cst_31 : f32 to vector<4x256xf32>
    %68 = arith.select %66, %61, %67 : vector<4x256xi1>, vector<4x256xf32>
    %c8 = arith.constant 8 : index
    %c0_32 = arith.constant 0 : index
    %69 = vector.load %arg13[%c8, %c0_32] : memref<36x256xf32, #tpu.memory_space<vmem>>, vector<4x256xf32>
    tpu.vector_store %arg13[%c8, %c0_32], %68 {strides = array<i32>} : memref<36x256xf32, #tpu.memory_space<vmem>>, vector<4x256xf32>,
    %c0_33 = arith.constant 0 : index
    %c127 = arith.constant 127 : index
    %70 = vector.load %arg12[%c0_33, %c127] : memref<4x401xf32, #tpu.memory_space<vmem>>, vector<4x256xf32>
    %c3 = arith.constant 3 : index
    %c0_34 = arith.constant 0 : index
    %71 = vector.load %arg10[%c3, %c0_34] : memref<9x256xf32, #tpu.memory_space<vmem>>, vector<1x256xf32>
    %cst_35 = arith.constant 0.000000e+00 : f32
    %72 = vector.broadcast %cst_35 : f32 to vector<1x256xf32>
    %73 = arith.cmpf one, %71, %72 : vector<1x256xf32>
    %cst_36 = arith.constant 0.000000e+00 : f32
    %74 = vector.shape_cast %73 : vector<1x256xi1> to vector<1x256xi1>
    %75 = vector.broadcast %74 : vector<1x256xi1> to vector<4x256xi1>
    %76 = vector.broadcast %cst_36 : f32 to vector<4x256xf32>
    %77 = arith.select %75, %70, %76 : vector<4x256xi1>, vector<4x256xf32>
    %c12 = arith.constant 12 : index
    %c0_37 = arith.constant 0 : index
    %78 = vector.load %arg13[%c12, %c0_37] : memref<36x256xf32, #tpu.memory_space<vmem>>, vector<4x256xf32>
    tpu.vector_store %arg13[%c12, %c0_37], %77 {strides = array<i32>} : memref<36x256xf32, #tpu.memory_space<vmem>>, vector<4x256xf32>,
    %c0_38 = arith.constant 0 : index
    %c128_39 = arith.constant 128 : index
    %79 = vector.load %arg12[%c0_38, %c128_39] : memref<4x401xf32, #tpu.memory_space<vmem>>, vector<4x256xf32>
    %c4_40 = arith.constant 4 : index
    %c0_41 = arith.constant 0 : index
    %80 = vector.load %arg10[%c4_40, %c0_41] : memref<9x256xf32, #tpu.memory_space<vmem>>, vector<1x256xf32>
    %cst_42 = arith.constant 0.000000e+00 : f32
    %81 = vector.broadcast %cst_42 : f32 to vector<1x256xf32>
    %82 = arith.cmpf one, %80, %81 : vector<1x256xf32>
    %cst_43 = arith.constant 0.000000e+00 : f32
    %83 = vector.shape_cast %82 : vector<1x256xi1> to vector<1x256xi1>
    %84 = vector.broadcast %83 : vector<1x256xi1> to vector<4x256xi1>
    %85 = vector.broadcast %cst_43 : f32 to vector<4x256xf32>
    %86 = arith.select %84, %79, %85 : vector<4x256xi1>, vector<4x256xf32>
    %c16 = arith.constant 16 : index
    %c0_44 = arith.constant 0 : index
    %87 = vector.load %arg13[%c16, %c0_44] : memref<36x256xf32, #tpu.memory_space<vmem>>, vector<4x256xf32>
    tpu.vector_store %arg13[%c16, %c0_44], %86 {strides = array<i32>} : memref<36x256xf32, #tpu.memory_space<vmem>>, vector<4x256xf32>,
    %c0_45 = arith.constant 0 : index
    %c129 = arith.constant 129 : index
    %88 = vector.load %arg12[%c0_45, %c129] : memref<4x401xf32, #tpu.memory_space<vmem>>, vector<4x256xf32>
    %c5 = arith.constant 5 : index
    %c0_46 = arith.constant 0 : index
    %89 = vector.load %arg10[%c5, %c0_46] : memref<9x256xf32, #tpu.memory_space<vmem>>, vector<1x256xf32>
    %cst_47 = arith.constant 0.000000e+00 : f32
    %90 = vector.broadcast %cst_47 : f32 to vector<1x256xf32>
    %91 = arith.cmpf one, %89, %90 : vector<1x256xf32>
    %cst_48 = arith.constant 0.000000e+00 : f32
    %92 = vector.shape_cast %91 : vector<1x256xi1> to vector<1x256xi1>
    %93 = vector.broadcast %92 : vector<1x256xi1> to vector<4x256xi1>
    %94 = vector.broadcast %cst_48 : f32 to vector<4x256xf32>
    %95 = arith.select %93, %88, %94 : vector<4x256xi1>, vector<4x256xf32>
    %c20 = arith.constant 20 : index
    %c0_49 = arith.constant 0 : index
    %96 = vector.load %arg13[%c20, %c0_49] : memref<36x256xf32, #tpu.memory_space<vmem>>, vector<4x256xf32>
    tpu.vector_store %arg13[%c20, %c0_49], %95 {strides = array<i32>} : memref<36x256xf32, #tpu.memory_space<vmem>>, vector<4x256xf32>,
    %c0_50 = arith.constant 0 : index
    %c143 = arith.constant 143 : index
    %97 = vector.load %arg12[%c0_50, %c143] : memref<4x401xf32, #tpu.memory_space<vmem>>, vector<4x256xf32>
    %c6 = arith.constant 6 : index
    %c0_51 = arith.constant 0 : index
    %98 = vector.load %arg10[%c6, %c0_51] : memref<9x256xf32, #tpu.memory_space<vmem>>, vector<1x256xf32>
    %cst_52 = arith.constant 0.000000e+00 : f32
    %99 = vector.broadcast %cst_52 : f32 to vector<1x256xf32>
    %100 = arith.cmpf one, %98, %99 : vector<1x256xf32>
    %cst_53 = arith.constant 0.000000e+00 : f32
    %101 = vector.shape_cast %100 : vector<1x256xi1> to vector<1x256xi1>
    %102 = vector.broadcast %101 : vector<1x256xi1> to vector<4x256xi1>
    %103 = vector.broadcast %cst_53 : f32 to vector<4x256xf32>
    %104 = arith.select %102, %97, %103 : vector<4x256xi1>, vector<4x256xf32>
    %c24 = arith.constant 24 : index
    %c0_54 = arith.constant 0 : index
    %105 = vector.load %arg13[%c24, %c0_54] : memref<36x256xf32, #tpu.memory_space<vmem>>, vector<4x256xf32>
    tpu.vector_store %arg13[%c24, %c0_54], %104 {strides = array<i32>} : memref<36x256xf32, #tpu.memory_space<vmem>>, vector<4x256xf32>,
    %c0_55 = arith.constant 0 : index
    %c144 = arith.constant 144 : index
    %106 = vector.load %arg12[%c0_55, %c144] : memref<4x401xf32, #tpu.memory_space<vmem>>, vector<4x256xf32>
    %c7 = arith.constant 7 : index
    %c0_56 = arith.constant 0 : index
    %107 = vector.load %arg10[%c7, %c0_56] : memref<9x256xf32, #tpu.memory_space<vmem>>, vector<1x256xf32>
    %cst_57 = arith.constant 0.000000e+00 : f32
    %108 = vector.broadcast %cst_57 : f32 to vector<1x256xf32>
    %109 = arith.cmpf one, %107, %108 : vector<1x256xf32>
    %cst_58 = arith.constant 0.000000e+00 : f32
    %110 = vector.shape_cast %109 : vector<1x256xi1> to vector<1x256xi1>
    %111 = vector.broadcast %110 : vector<1x256xi1> to vector<4x256xi1>
    %112 = vector.broadcast %cst_58 : f32 to vector<4x256xf32>
    %113 = arith.select %111, %106, %112 : vector<4x256xi1>, vector<4x256xf32>
    %c28 = arith.constant 28 : index
    %c0_59 = arith.constant 0 : index
    %114 = vector.load %arg13[%c28, %c0_59] : memref<36x256xf32, #tpu.memory_space<vmem>>, vector<4x256xf32>
    tpu.vector_store %arg13[%c28, %c0_59], %113 {strides = array<i32>} : memref<36x256xf32, #tpu.memory_space<vmem>>, vector<4x256xf32>,
    %c0_60 = arith.constant 0 : index
    %c145 = arith.constant 145 : index
    %115 = vector.load %arg12[%c0_60, %c145] : memref<4x401xf32, #tpu.memory_space<vmem>>, vector<4x256xf32>
    %c8_61 = arith.constant 8 : index
    %c0_62 = arith.constant 0 : index
    %116 = vector.load %arg10[%c8_61, %c0_62] : memref<9x256xf32, #tpu.memory_space<vmem>>, vector<1x256xf32>
    %cst_63 = arith.constant 0.000000e+00 : f32
    %117 = vector.broadcast %cst_63 : f32 to vector<1x256xf32>
    %118 = arith.cmpf one, %116, %117 : vector<1x256xf32>
    %cst_64 = arith.constant 0.000000e+00 : f32
    %119 = vector.shape_cast %118 : vector<1x256xi1> to vector<1x256xi1>
    %120 = vector.broadcast %119 : vector<1x256xi1> to vector<4x256xi1>
    %121 = vector.broadcast %cst_64 : f32 to vector<4x256xf32>
    %122 = arith.select %120, %115, %121 : vector<4x256xi1>, vector<4x256xf32>
    %c32 = arith.constant 32 : index
    %c0_65 = arith.constant 0 : index
    %123 = vector.load %arg13[%c32, %c0_65] : memref<36x256xf32, #tpu.memory_space<vmem>>, vector<4x256xf32>
    tpu.vector_store %arg13[%c32, %c0_65], %122 {strides = array<i32>} : memref<36x256xf32, #tpu.memory_space<vmem>>, vector<4x256xf32>,
    %c0_66 = arith.constant 0 : index
    %c0_67 = arith.constant 0 : index
    %124 = vector.load %arg4[%c0_66, %c0_67] : memref<4x36xf32, #tpu.memory_space<vmem>>, vector<4x36xf32>
    %c0_68 = arith.constant 0 : index
    %c0_69 = arith.constant 0 : index
    %125 = vector.load %arg13[%c0_68, %c0_69] : memref<36x256xf32, #tpu.memory_space<vmem>>, vector<36x256xf32>
    %cst_70 = arith.constant dense<0.000000e+00> : vector<4x256xf32>
    %126 = tpu.matmul %124, %125, %cst_70 {dimension_numbers = #tpu.dot_dimension_numbers<[1], [0], [0], [1], [0, 0, 1, 1], [], []>} : vector<4x36xf32>, vector<36x256xf32>, vector<4x256xf32> -> vector<4x256xf32>
    %c0_71 = arith.constant 0 : index
    %c0_72 = arith.constant 0 : index
    %127 = vector.load %arg5[%c0_71, %c0_72] : memref<4x1xf32, #tpu.memory_space<vmem>>, vector<4x1xf32>
    %128 = vector.broadcast %127 : vector<4x1xf32> to vector<4x256xf32>
    %129 = arith.addf %126, %128 : vector<4x256xf32>
    %c0_73 = arith.constant 0 : index
    %c0_74 = arith.constant 0 : index
    %130 = vector.load %arg6[%c0_73, %c0_74] : memref<1x256xf32, #tpu.memory_space<vmem>>, vector<1x256xf32>
    %c0_75 = arith.constant 0 : index
    %c0_76 = arith.constant 0 : index
    %131 = vector.load %arg7[%c0_75, %c0_76] : memref<1x256xf32, #tpu.memory_space<vmem>>, vector<1x256xf32>
    %c16_i32_77 = arith.constant 16 : i32
    %132 = tpu.dynamic_rotate %129 by %c16_i32_77 dim 1 : vector<4x256xf32>, i32 -> vector<4x256xf32>
    %133 = arith.addf %129, %132 : vector<4x256xf32>
    %c32_i32_78 = arith.constant 32 : i32
    %134 = tpu.dynamic_rotate %133 by %c32_i32_78 dim 1 : vector<4x256xf32>, i32 -> vector<4x256xf32>
    %135 = arith.addf %133, %134 : vector<4x256xf32>
    %c64_i32_79 = arith.constant 64 : i32
    %136 = tpu.dynamic_rotate %135 by %c64_i32_79 dim 1 : vector<4x256xf32>, i32 -> vector<4x256xf32>
    %137 = arith.addf %135, %136 : vector<4x256xf32>
    %c128_i32_80 = arith.constant 128 : i32
    %138 = tpu.dynamic_rotate %137 by %c128_i32_80 dim 1 : vector<4x256xf32>, i32 -> vector<4x256xf32>
    %139 = arith.addf %137, %138 : vector<4x256xf32>
    %cst_81 = arith.constant 6.250000e-02 : f32
    %140 = vector.broadcast %cst_81 : f32 to vector<4x256xf32>
    %141 = arith.mulf %139, %140 : vector<4x256xf32>
    %142 = arith.subf %129, %141 : vector<4x256xf32>
    %143 = arith.mulf %142, %142 : vector<4x256xf32>
    %c16_i32_82 = arith.constant 16 : i32
    %144 = tpu.dynamic_rotate %143 by %c16_i32_82 dim 1 : vector<4x256xf32>, i32 -> vector<4x256xf32>
    %145 = arith.addf %143, %144 : vector<4x256xf32>
    %c32_i32_83 = arith.constant 32 : i32
    %146 = tpu.dynamic_rotate %145 by %c32_i32_83 dim 1 : vector<4x256xf32>, i32 -> vector<4x256xf32>
    %147 = arith.addf %145, %146 : vector<4x256xf32>
    %c64_i32_84 = arith.constant 64 : i32
    %148 = tpu.dynamic_rotate %147 by %c64_i32_84 dim 1 : vector<4x256xf32>, i32 -> vector<4x256xf32>
    %149 = arith.addf %147, %148 : vector<4x256xf32>
    %c128_i32_85 = arith.constant 128 : i32
    %150 = tpu.dynamic_rotate %149 by %c128_i32_85 dim 1 : vector<4x256xf32>, i32 -> vector<4x256xf32>
    %151 = arith.addf %149, %150 : vector<4x256xf32>
    %cst_86 = arith.constant 6.250000e-02 : f32
    %152 = vector.broadcast %cst_86 : f32 to vector<4x256xf32>
    %153 = arith.mulf %151, %152 : vector<4x256xf32>
    %cst_87 = arith.constant 9.99999974E-6 : f32
    %154 = vector.broadcast %cst_87 : f32 to vector<4x256xf32>
    %155 = arith.addf %153, %154 : vector<4x256xf32>
    %156 = math.rsqrt %155 : vector<4x256xf32>
    %157 = arith.mulf %142, %156 : vector<4x256xf32>
    %158 = vector.broadcast %130 : vector<1x256xf32> to vector<4x256xf32>
    %159 = arith.mulf %157, %158 : vector<4x256xf32>
    %160 = vector.broadcast %131 : vector<1x256xf32> to vector<4x256xf32>
    %161 = arith.addf %159, %160 : vector<4x256xf32>
    %cst_88 = arith.constant 5.000000e-01 : f32
    %162 = vector.broadcast %cst_88 : f32 to vector<4x256xf32>
    %163 = arith.mulf %162, %161 : vector<4x256xf32>
    %cst_89 = arith.constant 0.707106769 : f32
    %164 = vector.broadcast %cst_89 : f32 to vector<4x256xf32>
    %165 = arith.mulf %161, %164 : vector<4x256xf32>
    %166 = math.erf %165 : vector<4x256xf32>
    %cst_90 = arith.constant 1.000000e+00 : f32
    %167 = vector.broadcast %cst_90 : f32 to vector<4x256xf32>
    %168 = arith.addf %167, %166 : vector<4x256xf32>
    %169 = arith.mulf %163, %168 : vector<4x256xf32>
    %c0_91 = arith.constant 0 : index
    %c128_92 = arith.constant 128 : index
    %170 = vector.load %arg12[%c0_91, %c128_92] : memref<4x401xf32, #tpu.memory_space<vmem>>, vector<4x256xf32>
    tpu.vector_store %arg12[%c0_91, %c128_92], %169 {strides = array<i32>} : memref<4x401xf32, #tpu.memory_space<vmem>>, vector<4x256xf32>,
    %c0_93 = arith.constant 0 : index
    %c111_94 = arith.constant 111 : index
    %171 = vector.load %arg12[%c0_93, %c111_94] : memref<4x401xf32, #tpu.memory_space<vmem>>, vector<4x256xf32>
    %c0_95 = arith.constant 0 : index
    %c0_96 = arith.constant 0 : index
    %172 = vector.load %arg10[%c0_95, %c0_96] : memref<9x256xf32, #tpu.memory_space<vmem>>, vector<1x256xf32>
    %cst_97 = arith.constant 0.000000e+00 : f32
    %173 = vector.broadcast %cst_97 : f32 to vector<1x256xf32>
    %174 = arith.cmpf one, %172, %173 : vector<1x256xf32>
    %cst_98 = arith.constant 0.000000e+00 : f32
    %175 = vector.shape_cast %174 : vector<1x256xi1> to vector<1x256xi1>
    %176 = vector.broadcast %175 : vector<1x256xi1> to vector<4x256xi1>
    %177 = vector.broadcast %cst_98 : f32 to vector<4x256xf32>
    %178 = arith.select %176, %171, %177 : vector<4x256xi1>, vector<4x256xf32>
    %c0_99 = arith.constant 0 : index
    %c0_100 = arith.constant 0 : index
    %179 = vector.load %arg13[%c0_99, %c0_100] : memref<36x256xf32, #tpu.memory_space<vmem>>, vector<4x256xf32>
    tpu.vector_store %arg13[%c0_99, %c0_100], %178 {strides = array<i32>} : memref<36x256xf32, #tpu.memory_space<vmem>>, vector<4x256xf32>,
    %c0_101 = arith.constant 0 : index
    %c112_102 = arith.constant 112 : index
    %180 = vector.load %arg12[%c0_101, %c112_102] : memref<4x401xf32, #tpu.memory_space<vmem>>, vector<4x256xf32>
    %c1_103 = arith.constant 1 : index
    %c0_104 = arith.constant 0 : index
    %181 = vector.load %arg10[%c1_103, %c0_104] : memref<9x256xf32, #tpu.memory_space<vmem>>, vector<1x256xf32>
    %cst_105 = arith.constant 0.000000e+00 : f32
    %182 = vector.broadcast %cst_105 : f32 to vector<1x256xf32>
    %183 = arith.cmpf one, %181, %182 : vector<1x256xf32>
    %cst_106 = arith.constant 0.000000e+00 : f32
    %184 = vector.shape_cast %183 : vector<1x256xi1> to vector<1x256xi1>
    %185 = vector.broadcast %184 : vector<1x256xi1> to vector<4x256xi1>
    %186 = vector.broadcast %cst_106 : f32 to vector<4x256xf32>
    %187 = arith.select %185, %180, %186 : vector<4x256xi1>, vector<4x256xf32>
    %c4_107 = arith.constant 4 : index
    %c0_108 = arith.constant 0 : index
    %188 = vector.load %arg13[%c4_107, %c0_108] : memref<36x256xf32, #tpu.memory_space<vmem>>, vector<4x256xf32>
    tpu.vector_store %arg13[%c4_107, %c0_108], %187 {strides = array<i32>} : memref<36x256xf32, #tpu.memory_space<vmem>>, vector<4x256xf32>,
    %c0_109 = arith.constant 0 : index
    %c113_110 = arith.constant 113 : index
    %189 = vector.load %arg12[%c0_109, %c113_110] : memref<4x401xf32, #tpu.memory_space<vmem>>, vector<4x256xf32>
    %c2_111 = arith.constant 2 : index
    %c0_112 = arith.constant 0 : index
    %190 = vector.load %arg10[%c2_111, %c0_112] : memref<9x256xf32, #tpu.memory_space<vmem>>, vector<1x256xf32>
    %cst_113 = arith.constant 0.000000e+00 : f32
    %191 = vector.broadcast %cst_113 : f32 to vector<1x256xf32>
    %192 = arith.cmpf one, %190, %191 : vector<1x256xf32>
    %cst_114 = arith.constant 0.000000e+00 : f32
    %193 = vector.shape_cast %192 : vector<1x256xi1> to vector<1x256xi1>
    %194 = vector.broadcast %193 : vector<1x256xi1> to vector<4x256xi1>
    %195 = vector.broadcast %cst_114 : f32 to vector<4x256xf32>
    %196 = arith.select %194, %189, %195 : vector<4x256xi1>, vector<4x256xf32>
    %c8_115 = arith.constant 8 : index
    %c0_116 = arith.constant 0 : index
    %197 = vector.load %arg13[%c8_115, %c0_116] : memref<36x256xf32, #tpu.memory_space<vmem>>, vector<4x256xf32>
    tpu.vector_store %arg13[%c8_115, %c0_116], %196 {strides = array<i32>} : memref<36x256xf32, #tpu.memory_space<vmem>>, vector<4x256xf32>,
    %c0_117 = arith.constant 0 : index
    %c127_118 = arith.constant 127 : index
    %198 = vector.load %arg12[%c0_117, %c127_118] : memref<4x401xf32, #tpu.memory_space<vmem>>, vector<4x256xf32>
    %c3_119 = arith.constant 3 : index
    %c0_120 = arith.constant 0 : index
    %199 = vector.load %arg10[%c3_119, %c0_120] : memref<9x256xf32, #tpu.memory_space<vmem>>, vector<1x256xf32>
    %cst_121 = arith.constant 0.000000e+00 : f32
    %200 = vector.broadcast %cst_121 : f32 to vector<1x256xf32>
    %201 = arith.cmpf one, %199, %200 : vector<1x256xf32>
    %cst_122 = arith.constant 0.000000e+00 : f32
    %202 = vector.shape_cast %201 : vector<1x256xi1> to vector<1x256xi1>
    %203 = vector.broadcast %202 : vector<1x256xi1> to vector<4x256xi1>
    %204 = vector.broadcast %cst_122 : f32 to vector<4x256xf32>
    %205 = arith.select %203, %198, %204 : vector<4x256xi1>, vector<4x256xf32>
    %c12_123 = arith.constant 12 : index
    %c0_124 = arith.constant 0 : index
    %206 = vector.load %arg13[%c12_123, %c0_124] : memref<36x256xf32, #tpu.memory_space<vmem>>, vector<4x256xf32>
    tpu.vector_store %arg13[%c12_123, %c0_124], %205 {strides = array<i32>} : memref<36x256xf32, #tpu.memory_space<vmem>>, vector<4x256xf32>,
    %c0_125 = arith.constant 0 : index
    %c128_126 = arith.constant 128 : index
    %207 = vector.load %arg12[%c0_125, %c128_126] : memref<4x401xf32, #tpu.memory_space<vmem>>, vector<4x256xf32>
    %c4_127 = arith.constant 4 : index
    %c0_128 = arith.constant 0 : index
    %208 = vector.load %arg10[%c4_127, %c0_128] : memref<9x256xf32, #tpu.memory_space<vmem>>, vector<1x256xf32>
    %cst_129 = arith.constant 0.000000e+00 : f32
    %209 = vector.broadcast %cst_129 : f32 to vector<1x256xf32>
    %210 = arith.cmpf one, %208, %209 : vector<1x256xf32>
    %cst_130 = arith.constant 0.000000e+00 : f32
    %211 = vector.shape_cast %210 : vector<1x256xi1> to vector<1x256xi1>
    %212 = vector.broadcast %211 : vector<1x256xi1> to vector<4x256xi1>
    %213 = vector.broadcast %cst_130 : f32 to vector<4x256xf32>
    %214 = arith.select %212, %207, %213 : vector<4x256xi1>, vector<4x256xf32>
    %c16_131 = arith.constant 16 : index
    %c0_132 = arith.constant 0 : index
    %215 = vector.load %arg13[%c16_131, %c0_132] : memref<36x256xf32, #tpu.memory_space<vmem>>, vector<4x256xf32>
    tpu.vector_store %arg13[%c16_131, %c0_132], %214 {strides = array<i32>} : memref<36x256xf32, #tpu.memory_space<vmem>>, vector<4x256xf32>,
    %c0_133 = arith.constant 0 : index
    %c129_134 = arith.constant 129 : index
    %216 = vector.load %arg12[%c0_133, %c129_134] : memref<4x401xf32, #tpu.memory_space<vmem>>, vector<4x256xf32>
    %c5_135 = arith.constant 5 : index
    %c0_136 = arith.constant 0 : index
    %217 = vector.load %arg10[%c5_135, %c0_136] : memref<9x256xf32, #tpu.memory_space<vmem>>, vector<1x256xf32>
    %cst_137 = arith.constant 0.000000e+00 : f32
    %218 = vector.broadcast %cst_137 : f32 to vector<1x256xf32>
    %219 = arith.cmpf one, %217, %218 : vector<1x256xf32>
    %cst_138 = arith.constant 0.000000e+00 : f32
    %220 = vector.shape_cast %219 : vector<1x256xi1> to vector<1x256xi1>
    %221 = vector.broadcast %220 : vector<1x256xi1> to vector<4x256xi1>
    %222 = vector.broadcast %cst_138 : f32 to vector<4x256xf32>
    %223 = arith.select %221, %216, %222 : vector<4x256xi1>, vector<4x256xf32>
    %c20_139 = arith.constant 20 : index
    %c0_140 = arith.constant 0 : index
    %224 = vector.load %arg13[%c20_139, %c0_140] : memref<36x256xf32, #tpu.memory_space<vmem>>, vector<4x256xf32>
    tpu.vector_store %arg13[%c20_139, %c0_140], %223 {strides = array<i32>} : memref<36x256xf32, #tpu.memory_space<vmem>>, vector<4x256xf32>,
    %c0_141 = arith.constant 0 : index
    %c143_142 = arith.constant 143 : index
    %225 = vector.load %arg12[%c0_141, %c143_142] : memref<4x401xf32, #tpu.memory_space<vmem>>, vector<4x256xf32>
    %c6_143 = arith.constant 6 : index
    %c0_144 = arith.constant 0 : index
    %226 = vector.load %arg10[%c6_143, %c0_144] : memref<9x256xf32, #tpu.memory_space<vmem>>, vector<1x256xf32>
    %cst_145 = arith.constant 0.000000e+00 : f32
    %227 = vector.broadcast %cst_145 : f32 to vector<1x256xf32>
    %228 = arith.cmpf one, %226, %227 : vector<1x256xf32>
    %cst_146 = arith.constant 0.000000e+00 : f32
    %229 = vector.shape_cast %228 : vector<1x256xi1> to vector<1x256xi1>
    %230 = vector.broadcast %229 : vector<1x256xi1> to vector<4x256xi1>
    %231 = vector.broadcast %cst_146 : f32 to vector<4x256xf32>
    %232 = arith.select %230, %225, %231 : vector<4x256xi1>, vector<4x256xf32>
    %c24_147 = arith.constant 24 : index
    %c0_148 = arith.constant 0 : index
    %233 = vector.load %arg13[%c24_147, %c0_148] : memref<36x256xf32, #tpu.memory_space<vmem>>, vector<4x256xf32>
    tpu.vector_store %arg13[%c24_147, %c0_148], %232 {strides = array<i32>} : memref<36x256xf32, #tpu.memory_space<vmem>>, vector<4x256xf32>,
    %c0_149 = arith.constant 0 : index
    %c144_150 = arith.constant 144 : index
    %234 = vector.load %arg12[%c0_149, %c144_150] : memref<4x401xf32, #tpu.memory_space<vmem>>, vector<4x256xf32>
    %c7_151 = arith.constant 7 : index
    %c0_152 = arith.constant 0 : index
    %235 = vector.load %arg10[%c7_151, %c0_152] : memref<9x256xf32, #tpu.memory_space<vmem>>, vector<1x256xf32>
    %cst_153 = arith.constant 0.000000e+00 : f32
    %236 = vector.broadcast %cst_153 : f32 to vector<1x256xf32>
    %237 = arith.cmpf one, %235, %236 : vector<1x256xf32>
    %cst_154 = arith.constant 0.000000e+00 : f32
    %238 = vector.shape_cast %237 : vector<1x256xi1> to vector<1x256xi1>
    %239 = vector.broadcast %238 : vector<1x256xi1> to vector<4x256xi1>
    %240 = vector.broadcast %cst_154 : f32 to vector<4x256xf32>
    %241 = arith.select %239, %234, %240 : vector<4x256xi1>, vector<4x256xf32>
    %c28_155 = arith.constant 28 : index
    %c0_156 = arith.constant 0 : index
    %242 = vector.load %arg13[%c28_155, %c0_156] : memref<36x256xf32, #tpu.memory_space<vmem>>, vector<4x256xf32>
    tpu.vector_store %arg13[%c28_155, %c0_156], %241 {strides = array<i32>} : memref<36x256xf32, #tpu.memory_space<vmem>>, vector<4x256xf32>,
    %c0_157 = arith.constant 0 : index
    %c145_158 = arith.constant 145 : index
    %243 = vector.load %arg12[%c0_157, %c145_158] : memref<4x401xf32, #tpu.memory_space<vmem>>, vector<4x256xf32>
    %c8_159 = arith.constant 8 : index
    %c0_160 = arith.constant 0 : index
    %244 = vector.load %arg10[%c8_159, %c0_160] : memref<9x256xf32, #tpu.memory_space<vmem>>, vector<1x256xf32>
    %cst_161 = arith.constant 0.000000e+00 : f32
    %245 = vector.broadcast %cst_161 : f32 to vector<1x256xf32>
    %246 = arith.cmpf one, %244, %245 : vector<1x256xf32>
    %cst_162 = arith.constant 0.000000e+00 : f32
    %247 = vector.shape_cast %246 : vector<1x256xi1> to vector<1x256xi1>
    %248 = vector.broadcast %247 : vector<1x256xi1> to vector<4x256xi1>
    %249 = vector.broadcast %cst_162 : f32 to vector<4x256xf32>
    %250 = arith.select %248, %243, %249 : vector<4x256xi1>, vector<4x256xf32>
    %c32_163 = arith.constant 32 : index
    %c0_164 = arith.constant 0 : index
    %251 = vector.load %arg13[%c32_163, %c0_164] : memref<36x256xf32, #tpu.memory_space<vmem>>, vector<4x256xf32>
    tpu.vector_store %arg13[%c32_163, %c0_164], %250 {strides = array<i32>} : memref<36x256xf32, #tpu.memory_space<vmem>>, vector<4x256xf32>,
    %c0_165 = arith.constant 0 : index
    %c0_166 = arith.constant 0 : index
    %252 = vector.load %arg8[%c0_165, %c0_166] : memref<4x36xf32, #tpu.memory_space<vmem>>, vector<4x36xf32>
    %c0_167 = arith.constant 0 : index
    %c0_168 = arith.constant 0 : index
    %253 = vector.load %arg13[%c0_167, %c0_168] : memref<36x256xf32, #tpu.memory_space<vmem>>, vector<36x256xf32>
    %cst_169 = arith.constant dense<0.000000e+00> : vector<4x256xf32>
    %254 = tpu.matmul %252, %253, %cst_169 {dimension_numbers = #tpu.dot_dimension_numbers<[1], [0], [0], [1], [0, 0, 1, 1], [], []>} : vector<4x36xf32>, vector<36x256xf32>, vector<4x256xf32> -> vector<4x256xf32>
    %c0_170 = arith.constant 0 : index
    %c0_171 = arith.constant 0 : index
    %255 = vector.load %arg9[%c0_170, %c0_171] : memref<4x1xf32, #tpu.memory_space<vmem>>, vector<4x1xf32>
    %256 = vector.broadcast %255 : vector<4x1xf32> to vector<4x256xf32>
    %257 = arith.addf %254, %256 : vector<4x256xf32>
    %258 = arith.addf %257, %1 : vector<4x256xf32>
    %c0_172 = arith.constant 0 : index
    %c0_173 = arith.constant 0 : index
    %c0_174 = arith.constant 0 : index
    %259 = vector.load %arg11[%c0_172, %c0_173, %c0_174] : memref<1x4x256xf32, #tpu.memory_space<vmem>>, vector<1x4x256xf32>
    %260 = vector.shape_cast %259 : vector<1x4x256xf32> to vector<4x256xf32>
    %261 = vector.shape_cast %258 : vector<4x256xf32> to vector<1x4x256xf32>
    tpu.vector_store %arg11[%c0_172, %c0_173, %c0_174], %261 {strides = array<i32>} : memref<1x4x256xf32, #tpu.memory_space<vmem>>, vector<1x4x256xf32>,
    return
  }
  func.func @transform_0(%arg0: i32) -> (i32, i32, i32) {
    %c0_i32 = arith.constant 0 : i32
    %c0_i32_0 = arith.constant 0 : i32
    %c0_i32_1 = arith.constant 0 : i32
    return %arg0, %c0_i32, %c0_i32_0 : i32, i32, i32
  }
  func.func @transform_1(%arg0: i32) -> (i32, i32) {
    %c0_i32 = arith.constant 0 : i32
    %c0_i32_0 = arith.constant 0 : i32
    %c0_i32_1 = arith.constant 0 : i32
    return %c0_i32, %c0_i32_0 : i32, i32
  }
  func.func @transform_2(%arg0: i32) -> (i32, i32) {
    %c0_i32 = arith.constant 0 : i32
    %c0_i32_0 = arith.constant 0 : i32
    %c0_i32_1 = arith.constant 0 : i32
    return %c0_i32, %c0_i32_0 : i32, i32
  }
  func.func @transform_3(%arg0: i32) -> (i32, i32) {
    %c0_i32 = arith.constant 0 : i32
    %c0_i32_0 = arith.constant 0 : i32
    %c0_i32_1 = arith.constant 0 : i32
    return %c0_i32, %c0_i32_0 : i32, i32
  }
  func.func @transform_4(%arg0: i32) -> (i32, i32) {
    %c0_i32 = arith.constant 0 : i32
    %c0_i32_0 = arith.constant 0 : i32
    %c0_i32_1 = arith.constant 0 : i32
    return %c0_i32, %c0_i32_0 : i32, i32
  }
  func.func @transform_5(%arg0: i32) -> (i32, i32) {
    %c0_i32 = arith.constant 0 : i32
    %c0_i32_0 = arith.constant 0 : i32
    %c0_i32_1 = arith.constant 0 : i32
    return %c0_i32, %c0_i32_0 : i32, i32
  }
  func.func @transform_6(%arg0: i32) -> (i32, i32) {
    %c0_i32 = arith.constant 0 : i32
    %c0_i32_0 = arith.constant 0 : i32
    %c0_i32_1 = arith.constant 0 : i32
    return %c0_i32, %c0_i32_0 : i32, i32
  }
  func.func @transform_7(%arg0: i32) -> (i32, i32) {
    %c0_i32 = arith.constant 0 : i32
    %c0_i32_0 = arith.constant 0 : i32
    %c0_i32_1 = arith.constant 0 : i32
    return %c0_i32, %c0_i32_0 : i32, i32
  }
  func.func @transform_8(%arg0: i32) -> (i32, i32) {
    %c0_i32 = arith.constant 0 : i32
    %c0_i32_0 = arith.constant 0 : i32
    %c0_i32_1 = arith.constant 0 : i32
    return %c0_i32, %c0_i32_0 : i32, i32
  }
  func.func @transform_9(%arg0: i32) -> (i32, i32) {
    %c0_i32 = arith.constant 0 : i32
    %c0_i32_0 = arith.constant 0 : i32
    %c0_i32_1 = arith.constant 0 : i32
    return %c0_i32, %c0_i32_0 : i32, i32
  }
  func.func @transform_10(%arg0: i32) -> (i32, i32, i32) {
    %c0_i32 = arith.constant 0 : i32
    %c0_i32_0 = arith.constant 0 : i32
    %c0_i32_1 = arith.constant 0 : i32
    return %arg0, %c0_i32, %c0_i32_0 : i32, i32, i32
  }
}

</mosaic_0001>

<bundles_post_ra>
// kernel: tpu_custom_call.1
= control target key start
LH: loop header
LB: loop body
LE: loop exit
PB: predicated region body
PF: predicated region fallthrough
CT: control target
= control target key end

     0   :  { %s2640_s0 = inlined_call_operand.hbm [shape: f32[2,4,256], index: 0, kind: input, shape index: {}]   ;;  %s2641_s1 = inlined_call_operand.vmem [shape: f32[1,256], index: 1, kind: input, shape index: {}]   ;;  %s2642_s2 = inlined_call_operand.vmem [shape: f32[1,256], index: 2, kind: input, shape index: {}]   ;;  %s2643_s3 = inlined_call_operand.vmem [shape: f32[4,36], index: 3, kind: input, shape index: {}]   ;;  %s2644_s4 = inlined_call_operand.vmem [shape: f32[4,1], index: 4, kind: input, shape index: {}]   ;;  %s2645_s5 = inlined_call_operand.hbm [shape: f32[1,256], index: 5, kind: input, shape index: {}]   ;;  %s2646_s6 = inlined_call_operand.hbm [shape: f32[1,256], index: 6, kind: input, shape index: {}]   ;;  %s2647_s7 = inlined_call_operand.vmem [shape: f32[4,36], index: 7, kind: input, shape index: {}]   ;;  %s2648_s8 = inlined_call_operand.vmem [shape: f32[4,1], index: 8, kind: input, shape index: {}]   ;;  %s2649_s9 = inlined_call_operand.vmem [shape: f32[9,256], index: 9, kind: input, shape index: {}]   ;;  %s2650_s10 = inlined_call_operand.hbm [shape: f32[2,4,256], index: 10, kind: output, shape index: {}]  }
   0x1   :  { %2666 = sst [smem:[#allocation15_spill]] %s2645_s5 }
   0x2   :  { %15 = vsyncpa [#allocation5], 0 }
   0x3   :  { %17 = vsyncpa [#allocation5 + $0x1], 0 }
   0x4   :  { %18 = vsyncpa [#allocation8], 0 }
   0x5   :  { %19 = vsyncpa [#allocation6], 0 }
   0x6   :  { %21 = vsyncpa [#allocation6 + $0x1], 0  ;;  %s1950_s13 = smov 0   ;;  %s1952_s14 = smov 0  }
   0x7   :  { %s1954_s15 = smov 0   ;;  %s1956_s16 = smov 0  }
   0x8 LB: > { %s1971_s17 = sadd.s32 4294967295, %s1877_s16   ;;  %s1568_s18 = sadd.s32 4294967294, %s1877_s16   ;;  %s1877_s16 = sphi %s1956_s16, %s2733_s16   ;;  %s1873_s15 = sphi %s1954_s15, %s2732_s15   ;;  %s1869_s14 = sphi %s1952_s14, %s2731_s14   ;;  %s1865_s13 = sphi %s1950_s13, %s2730_s13  }
   0x9   : > { %p47_p0 = scmp.ne.s32.totalorder %s1869_s14, %s1865_s13  ;;  %p2651_p1 = scmp.eq.s32.totalorder %s1971_s17, 0 }
   0xa   : > { %p266_p3 = scmp.eq.s32.totalorder %s1568_s18, 1  ;;  %p1569_p5 = scmp.ge.s32.totalorder %s1877_s16, 1 }
   0xb   : > { %p1980_p4 = por %p2651_p1, %p47_p0  ;;  %p273_p7 = scmp.lt.s32.totalorder %s1877_s16, 3 }
   0xc   : > { %p1985_p6 = por %p266_p3, %p47_p0  ;;  %s1879_s22 = smov [#allocation7]  }
   0xd   : > { %s2667_s19 = scalar_select %p1980_p4, 1, 0 }
   0xe   : > { %s2668_s20 = scalar_select %p1985_p6, 1, 0 }
   0xf   : > { %p1990_p8 = pnand %p1569_p5, %p273_p7  ;;  %s298_s23 = sshll.u32 %s1879_s22, 4  ;;  %s299_s23 = int_to_ptr.vmem [resolvable:$true] %s298_s23 }
  0x10   : > { %2669 = sst [smem:[#allocation14_spill]] %s2668_s20  ;;  %s1880_s24 = smov [#allocation9]  }
  0x11   : > { %s2670_s21 = scalar_select %p1990_p8, 1, 0 }
  0x12   : > { %p1638_p10 = pneg %p1990_p8  ;;  %s309_s25 = sshll.u32 %s1880_s24, 4  ;;  %s2003_s25 = int_to_ptr.vmem [resolvable:$true] %s309_s25 }
  0x13   : > { %s2006_s27 = sadd.s32 1, %s1877_s16   ;;  %s2672_s5 = sld [smem:[#allocation15_spill]] }
  0x14   : > { %p1999_p11 = pnand %p1638_p10, %p2651_p1 }
  0x16   : > { %p1723_p13 = pneg %p1999_p11 }
  0x19   : > { %s1721_s11 = scalar_lea.hbm %s2672_s5, 32 }
  0x1a   : > { %p1722_p12 = scmp.ne.s32.totalorder %s2672_s5, %s1721_s11  ;;  %p1728_p5 = scmp.lt.u32.totalorder %s1721_s11, %s2672_s5 }
  0x1c   : > { %p1724_p0 = pnand %p1723_p13, %p1722_p12 }
  0x1e   : > { %p1725_p3 = pneg %p1724_p0 }
  0x20   : > { %p1730_p7 = pnand %p1728_p5, %p1725_p3 }
  0x22   : > { %1733 = shalt.err (!%p1730_p7)
}
  0x23   : > { %s1734_s28 = scalar_lea.vmem %s299_s23, 32  ;;  %p1742_p2 = scmp.lt.s32.totalorder %s299_s23, %s299_s23 }
  0x24   : > { %p1735_p10 = scmp.ne.s32.totalorder %s299_s23, %s1734_s28  ;;  %p1743_p6 = scmp.lt.s32.totalorder %s1734_s28, %s1734_s28 }
  0x26   : > { %p1737_p9 = pnand %p1735_p10, %p1723_p13  ;;  %p1744_p4 = por %p1743_p6, %p1742_p2 }
  0x28   : > { %p1738_p1 = pneg %p1737_p9 }
  0x2a   : > { %p1745_p8 = pnand %p1744_p4, %p1738_p1 }
  0x2c   : > { %1748 = shalt.err (!%p1745_p8)
}
  0x2d   : > { %1641 = dma.hbm_to_vmem [thread:$0]  (!%p1999_p11), %s2672_s5, 32, %s299_s23, [#allocation8]  }
  0x2e   : > { %s1749_s18 = scalar_lea.hbm %s2646_s6, 32 }
  0x2f   : > { %p1750_p9 = scmp.ne.s32.totalorder %s2646_s6, %s1749_s18  ;;  %p1756_p4 = scmp.lt.u32.totalorder %s1749_s18, %s2646_s6 }
  0x31   : > { %p1752_p2 = pnand %p1750_p9, %p1723_p13 }
  0x33   : > { %p1753_p1 = pneg %p1752_p2 }
  0x35   : > { %p1758_p6 = pnand %p1756_p4, %p1753_p1 }
  0x37   : > { %1761 = shalt.err (!%p1758_p6)
}
  0x38   : > { %s1762_s23 = scalar_lea.vmem %s2003_s25, 32  ;;  %p1770_p3 = scmp.lt.s32.totalorder %s2003_s25, %s2003_s25 }
  0x39   : > { %p1763_p8 = scmp.ne.s32.totalorder %s2003_s25, %s1762_s23  ;;  %p1771_p5 = scmp.lt.s32.totalorder %s1762_s23, %s1762_s23 }
  0x3b   : > { %p1765_p12 = pnand %p1763_p8, %p1723_p13  ;;  %p1772_p7 = por %p1771_p5, %p1770_p3 }
  0x3d   : > { %p1766_p0 = pneg %p1765_p12 }
  0x3f   : > { %p1773_p10 = pnand %p1772_p7, %p1766_p0 }
  0x41   : > { %1776 = shalt.err (!%p1773_p10)
}
  0x42   : > { %1644 = dma.hbm_to_vmem [thread:$0]  (!%p1999_p11), %s2646_s6, 32, %s2003_s25, [#allocation8]  }
  0x43   : > { %s2673_s30 = ssub.s32 %s1877_s16, %s2006_s27  ;;  %s34_s11 = sadd.s32 1, %s1873_s15 }
  0x44   : > { %p32_p13 = scmp.eq.s32.totalorder %s2673_s30, 0  ;;  %p41_p9 = scmp.ne.s32.totalorder %s1873_s15, %s1869_s14 }
  0x45   : > { %p42_p2 = scmp.eq.s32.totalorder %s1877_s16, 0  ;;  %p2674_p4 = scmp.eq.s32.totalorder %s1971_s17, 1 }
  0x46   : > { %s2065_s26 = scalar_select %p32_p13, %s1873_s15, %s34_s11  }
  0x47   : > { %p43_p1 = por %p42_p2, %p41_p9  ;;  %p2069_p6 = por %p2674_p4, %p41_p9 }
  0x48   : > { %p1655_p8 = scmp.lt.s32.totalorder %s1877_s16, 2  ;;  %s329_s18 = sand.u32 1, %s1873_s15  }
  0x49   : > { %s1573_s22 = sshll.u32 %s329_s18, 3  ;;  %s1608_s24 = sshll.u32 %s1877_s16, 7 }
  0x4a   : > { %s2079_s25 = scalar_lea.hbm %s2640_s0, %s1608_s24  ;;  %s333_s20 = scalar_lea.vmem [#allocation4], %s1573_s22 }
  0x4b   : > { %s341_s29 = sshll.u32 %s333_s20, 4  ;;  %p2083_p11 = pnand %p1655_p8, %p43_p1  ;;  %s2081_s29 = int_to_ptr.vmem [resolvable:$true] %s341_s29 }
  0x4c   : > { %s330_s11 = scalar_lea.sflag [#allocation5], %s329_s18  ;;  %s1777_s5 = scalar_lea.hbm %s2079_s25, 128 }
  0x4d   : > { %p1778_p12 = scmp.ne.s32.totalorder %s2079_s25, %s1777_s5  ;;  %p1779_p0 = pneg %p2083_p11 }
  0x4e   : > { %s1782_s28 = scalar_lea.hbm %s2640_s0, 256  ;;  %p1783_p7 = scmp.lt.u32.totalorder %s2079_s25, %s2640_s0 }
  0x4f   : > { %p1780_p3 = pnand %p1779_p0, %p1778_p12  ;;  %p1784_p10 = scmp.lt.u32.totalorder %s1782_s28, %s1777_s5 }
  0x50   : > { %p1786_p9 = scmp.lt.u32.totalorder %s1777_s5, %s2079_s25 }
  0x51   : > { %p1781_p5 = pneg %p1780_p3  ;;  %p1785_p13 = por %p1784_p10, %p1783_p7 }
  0x53   : > { %p1787_p2 = por %p1786_p9, %p1785_p13 }
  0x55   : > { %p1788_p1 = pnand %p1787_p2, %p1781_p5 }
  0x57   : > { %1791 = shalt.err (!%p1788_p1)
}
  0x58   : > { %s1792_s18 = scalar_lea.vmem %s2081_s29, 128  ;;  %s1881_s24 = smov [#allocation4]  }
  0x59   : > { %p1793_p4 = scmp.ne.s32.totalorder %s2081_s29, %s1792_s18  ;;  %s1797_s22 = sshll.u32 %s1881_s24, 4  ;;  %s1798_s22 = int_to_ptr.vmem [resolvable:$false] %s1797_s22 }
  0x5a   : > { %s1799_s23 = scalar_lea.vmem %s1798_s22, 256  ;;  %p1800_p3 = scmp.lt.s32.totalorder %s2081_s29, %s1798_s22 }
  0x5b   : > { %p1795_p8 = pnand %p1793_p4, %p1779_p0  ;;  %p1801_p7 = scmp.lt.s32.totalorder %s1799_s23, %s1792_s18 }
  0x5d   : > { %p1796_p12 = pneg %p1795_p8  ;;  %p1802_p10 = por %p1801_p7, %p1800_p3 }
  0x5f   : > { %p1803_p13 = pnand %p1802_p10, %p1796_p12 }
  0x61   : > { %1806 = shalt.err (!%p1803_p13)
}
  0x62   : > { %1648 = dma.hbm_to_vmem [thread:$0]  (!%p2083_p11), %s2079_s25, 128, %s2081_s29, %s330_s11  }
  0x63   : > { %p2677_p5 = scmp.ne.s32.totalorder %s2670_s21, 0 }
  0x64   : > { %s2115_s5 = sand.u32 (!%p2677_p5), 1, %s1869_s14   ;;  %p2678_p0 = scmp.ne.s32.totalorder (!%p2677_p5), %s2667_s19, 0 }
  0x65   : > { %350 = sbr.rel (%p2677_p5) target bundleno = 2475 (0x9ab), region = 60  ;;  %s2655_s28 = sshll.u32 (!%p2677_p5), %s2115_s5, 3 }
  0x66   : > { %s353_s20 = scalar_lea.sflag (!%p2677_p5), [#allocation5], %s2115_s5  ;;  %s2121_s18 = scalar_lea.vmem (!%p2677_p5), [#allocation4], %s2655_s28 }
  0x6c   : > { %1852 = dma.done.wait (%p2678_p0), %s353_s20, 128  }
  0x6d   : > { %1854 = vsyncadd (%p2678_p0), %s353_s20, 4294967168  ;;  %p2679_p11 = scmp.eq.s32.totalorder %s1971_s17, 0 }
  0x6f   : > { %1856 = dma.done.wait (%p2679_p11), [#allocation8], 64   ;;  %p2680_p9 = pmov %p2679_p11 }
  0x70   : > { %v401_v0 = vld [vmem:[%s2121_s18] sm:$0xff]  ;;  %s1882_s21 = smov 16   ;;  %v411_v2 = vlaneseq  ;;  %s1883_s19 = smov 32   ;;  %v1886_v46 = vmov 0   ;;  %vm598_vm9 = vcmask 130048   ;;  %vm672_vm14 = vcmask 7168  }
  0x71   : > { %1858 = vsyncadd (%p2680_p9), [#allocation8], 4294967232  ;;  %407 = vrot.lane.b32.xlu0 %v401_v0, %s1882_s21  ;;  %v2133_v1 = vcombine.high %v401_v0, %v401_v0  ;;  %s1884_s25 = smov 64   ;;  %v710_v45 = vld [vmem:[#allocation2 + $0xc] sm:$0xf]  ;;  %s1885_s29 = smov 127  }
  0x72   : > { %v2138_v3 = vand.u32 127, %v411_v2  ;;  %1705 = vset.pattern.permute.xlu0 %v1886_v46  ;;  %v784_v47 = vld [vmem:[#allocation2 + $0xc] sm:$0xf]  ;;  %s1887_s30 = smov 112   ;;  %s2664_s11 = smov 113   ;;  %v512_v59 = vshrl.u32 %v411_v2, 7 }
  0x73   : > { %v750_v48 = vld [vmem:[#allocation2 + $0xc] sm:$0xf]  ;;  %v402_v63 = vld [vmem:[%s2641_s1] sm:$0x3]  ;;  %s2660_s23 = smov 1   ;;  %s2658_s20 = smov 17  }
  0x74   : > { %vm413_vm0 = vcmp.lt.s32.totalorder %v2138_v3, 16  ;;  %vm428_vm1 = vcmp.lt.s32.totalorder %v2138_v3, 32  ;;  %vm443_vm2 = vcmp.lt.s32.totalorder %v2138_v3, 64  ;;  %v2182_v61 = vsub.s32 0, %v512_v59  ;;  %s2656_s24 = smov 15   ;;  %s2662_s22 = smov 111  }
  0x75   : > { %409 = vrot.lane.b32.xlu0 %v2133_v1, %s1882_s21  ;;  %v2184_v62 = vsub.s32 1, %v512_v59  ;;  %s2705_s28 = smov 111  }
  0xe3   : > { %v408_v4 = vpop.permute.xlu0 %407 }
  0xe7   : > { %v410_v5 = vpop.permute.xlu0 %409 }
  0xe8   : > { %v414_v6 = vsel %vm413_vm0, %v408_v4, %v410_v5  ;;  %v415_v7 = vsel %vm413_vm0, %v410_v5, %v408_v4  ;;  %v514_v4 = vrot.slane %v402_v63, %v2182_v61  ;;  %v518_v5 = vrot.slane %v402_v63, %v2184_v62 }
  0xe9   : > { %v418_v8 = vcombine.low %v415_v7, %v414_v6 }
  0xea   : > { %v519_v7 = vcombine.low %v514_v4, %v518_v5  ;;  %v1585_v5 = vld [vmem:[%s2649_s9 + $0x5] ss:$8 sm:$0x3] }
  0xeb   : > { %v420_v9 = vadd.f32 %v418_v8, %v401_v0 }
  0xed   : > { %424 = vrot.lane.b32.xlu1 %v420_v9, %s1883_s19  ;;  %v422_v10 = vcombine.high %v420_v9, %v420_v9 }
  0xf1   : > { %426 = vrot.lane.b32.xlu1 %v422_v10, %s1883_s19 }
 0x15f   : > { %v425_v11 = vpop.permute.xlu1 %424 }
 0x163   : > { %v427_v12 = vpop.permute.xlu1 %426 }
 0x164   : > { %v429_v13 = vsel %vm428_vm1, %v425_v11, %v427_v12  ;;  %v430_v14 = vsel %vm428_vm1, %v427_v12, %v425_v11 }
 0x165   : > { %v433_v15 = vcombine.low %v430_v14, %v429_v13  ;;  %v1584_v14 = vld [vmem:[%s2649_s9 + $0x4] ss:$8 sm:$0x3] }
 0x166   : > { %vm690_vm3 = vcmp.ne.f32.partialorder %v1584_v14, 0.0 }
 0x167   : > { %v435_v16 = vadd.f32 %v433_v15, %v420_v9  ;;  %v691_v15 = vsel %vm690_vm3, 1, %v1886_v46  ;;  %vm564_vm3 = vcmask 138240  }
 0x169   : > { %439 = vrot.lane.b32.xlu0 %v435_v16, %s1884_s25  ;;  %v437_v17 = vcombine.high %v435_v16, %v435_v16 }
 0x16b   : > { %441 = vrot.lane.b32.xlu1 %v437_v17, %s1884_s25 }
 0x1db   : > { %v440_v18 = vpop.permute.xlu0 %439 }
 0x1dd   : > { %v442_v19 = vpop.permute.xlu1 %441 }
 0x1de   : > { %v444_v20 = vsel %vm443_vm2, %v440_v18, %v442_v19  ;;  %v445_v21 = vsel %vm443_vm2, %v442_v19, %v440_v18  ;;  %v699_v18 = vrot.slane %v691_v15, %v2184_v62 }
 0x1df   : > { %v448_v22 = vcombine.low %v445_v21, %v444_v20 }
 0x1e0   : > { %vm701_vm5 = vcmp.eq.s32.totalorder %v699_v18, 1  ;;  %v1588_v18 = vld [vmem:[%s2649_s9 + $0x10] ss:$8 sm:$0x3] }
 0x1e1   : > { %v450_v23 = vadd.f32 %v448_v22, %v435_v16  ;;  %v695_v16 = vrot.slane %v691_v15, %v2182_v61 }
 0x1e3   : > { %v452_v24 = vcombine.high %v450_v23, %v450_v23  ;;  %vm700_vm4 = vcmp.eq.s32.totalorder %v695_v16, 1 }
 0x1e5   : > { %v453_v25 = vcombine.low %v452_v24, %v450_v23 }
 0x1e7   : > { %v455_v26 = vadd.f32 %v453_v25, %v450_v23 }
 0x1e9   : > { %v456_v27 = vmul.f32 0.0625, %v455_v26 }
 0x1eb   : > { %v457_v28 = vsub.f32 %v401_v0, %v456_v27  ;;  %v403_v0 = vld [vmem:[%s2642_s2] sm:$0x3] }
 0x1ec   : > { %v526_v2 = vrot.slane %v403_v0, %v2182_v61  ;;  %v530_v6 = vrot.slane %v403_v0, %v2184_v62 }
 0x1ed   : > { %v458_v29 = vmul.f32 %v457_v28, %v457_v28 }
 0x1ee   : > { %v531_v9 = vcombine.low %v526_v2, %v530_v6 }
 0x1ef   : > { %462 = vrot.lane.b32.xlu0 %v458_v29, %s1882_s21  ;;  %v460_v30 = vcombine.high %v458_v29, %v458_v29 }
 0x1f1   : > { %464 = vrot.lane.b32.xlu1 %v460_v30, %s1882_s21 }
 0x261   : > { %v463_v31 = vpop.permute.xlu0 %462 }
 0x263   : > { %v465_v32 = vpop.permute.xlu1 %464 }
 0x264   : > { %v466_v33 = vsel %vm413_vm0, %v463_v31, %v465_v32  ;;  %v467_v34 = vsel %vm413_vm0, %v465_v32, %v463_v31  ;;  %v824_v31 = vld [vmem:[#allocation2 + $0xc] sm:$0xf]  ;;  %v1893_v32 = vmov 0.0  }
 0x265   : > { %v470_v35 = vcombine.low %v467_v34, %v466_v33  ;;  %949 = vmatprep.mubr.f32.mxu0 %v1893_v32  ;;  %v868_v33 = vld [vmem:[%s2644_s4] sm:$0xf]  ;;  %1450 = vmatprep.mubr.f32.mxu1 %v1893_v32 }
 0x267   : > { %v472_v36 = vadd.f32 %v470_v35, %v458_v29 }
 0x269   : > { %476 = vrot.lane.b32.xlu0 %v472_v36, %s1883_s19  ;;  %v474_v37 = vcombine.high %v472_v36, %v472_v36 }
 0x26b   : > { %478 = vrot.lane.b32.xlu1 %v474_v37, %s1883_s19  ;;  %v1581_v37 = vld [vmem:[%s2649_s9 + $0x1] ss:$8 sm:$0x3] }
 0x26c   : > { %vm577_vm6 = vcmp.ne.f32.partialorder %v1581_v37, 0.0 }
 0x2db   : > { %v477_v38 = vpop.permute.xlu0 %476 }
 0x2dd   : > { %v479_v39 = vpop.permute.xlu1 %478 }
 0x2de   : > { %v480_v40 = vsel %vm428_vm1, %v477_v38, %v479_v39  ;;  %v481_v41 = vsel %vm428_vm1, %v479_v39, %v477_v38 }
 0x2df   : > { %v484_v42 = vcombine.low %v481_v41, %v480_v40  ;;  %v1583_v40 = vld [vmem:[%s2649_s9 + $0x3] ss:$8 sm:$0x3] }
 0x2e0   : > { %vm651_vm7 = vcmp.ne.f32.partialorder %v1583_v40, 0.0 }
 0x2e1   : > { %v486_v43 = vadd.f32 %v484_v42, %v472_v36 }
 0x2e3   : > { %490 = vrot.lane.b32.xlu0 %v486_v43, %s1884_s25  ;;  %v488_v44 = vcombine.high %v486_v43, %v486_v43 }
 0x2e5   : > { %492 = vrot.lane.b32.xlu1 %v488_v44, %s1884_s25  ;;  %v542_v44 = vld [vmem:[%s2649_s9] ss:$8 sm:$0x3] }
 0x2e6   : > { %vm543_vm8 = vcmp.ne.f32.partialorder %v542_v44, 0.0 }
 0x2e9   : > { %732 = vrot.lane.b32.xlu1 %v710_v45, %s1885_s29  ;;  %v652_v45 = vsel %vm651_vm7, 1, %v1886_v46 }
 0x2ed   : > { %806 = vrot.lane.b32.xlu1 %v784_v47, %s1887_s30 }
 0x2f1   : > { %772 = vrot.lane.b32.xlu1 %v750_v48, %s2664_s11 }
 0x355   : > { %v491_v49 = vpop.permute.xlu0 %490 }
 0x357   : > { %v493_v50 = vpop.permute.xlu1 %492 }
 0x358   : > { %v494_v51 = vsel %vm443_vm2, %v491_v49, %v493_v50  ;;  %v495_v52 = vsel %vm443_vm2, %v493_v50, %v491_v49 }
 0x359   : > { %v498_v53 = vcombine.low %v495_v52, %v494_v51  ;;  %v656_v51 = vrot.slane %v652_v45, %v2182_v61  ;;  %v1582_v52 = vld [vmem:[%s2649_s9 + $0x2] ss:$8 sm:$0x3] }
 0x35a   : > { %vm617_vm12 = vcmp.ne.f32.partialorder %v1582_v52, 0.0 }
 0x35b   : > { %v500_v54 = vadd.f32 %v498_v53, %v486_v43  ;;  %v2226_v34 = vpop.permute.xlu1 %732  ;;  %v578_v43 = vsel %vm577_vm6, 1, %v1886_v46  ;;  %v660_v53 = vrot.slane %v652_v45, %v2184_v62  ;;  %vm2255_vm13 = vcmp.eq.s32.totalorder %v656_v51, 1 }
 0x35c   : > { %v582_v47 = vrot.slane %v578_v43, %v2182_v61  ;;  %v586_v48 = vrot.slane %v578_v43, %v2184_v62 }
 0x35d   : > { %v502_v55 = vcombine.high %v500_v54, %v500_v54  ;;  %vm2259_vm15 = vcmp.eq.s32.totalorder %v660_v53, 1 }
 0x35e   : > { %vm587_vm10 = vcmp.eq.s32.totalorder %v582_v47, 1  ;;  %vm588_vm11 = vcmp.eq.s32.totalorder %v586_v48, 1 }
 0x35f   : > { %v503_v56 = vcombine.low %v502_v55, %v500_v54  ;;  %v2228_v35 = vpop.permute.xlu1 %806 }
 0x361   : > { %v505_v57 = vadd.f32 %v503_v56, %v500_v54  ;;  %v544_v54 = vsel %vm543_vm8, 1, %v1886_v46  ;;  %vm638_vm8 = vcmask 121856  }
 0x362   : > { %v548_v4 = vrot.slane %v544_v54, %v2182_v61 }
 0x363   : > { %v506_v58 = vmul.f32 0.0625, %v505_v57  ;;  %v2230_v36 = vpop.permute.xlu1 %772 }
 0x365   : > { %v507_v60 = vadd.f32 1e-05, %v506_v58 }
 0x367   : > { %1709 = vrsqrt.f32 %v507_v60 }
 0x371   : > { %v1710_v8 = vpop.eup %1709 }
 0x372   : > { %v509_v10 = vmul.f32 %v1710_v8, %v457_v28  ;;  %v618_v8 = vsel %vm617_vm12, 1, %v1886_v46 }
 0x373   : > { %v622_v16 = vrot.slane %v618_v8, %v2182_v61 }
 0x374   : > { %v521_v11 = vmul.f32 %v519_v7, %v509_v10  ;;  %v552_v7 = vrot.slane %v544_v54, %v2184_v62 }
 0x376   : > { %v533_v12 = vadd.f32 %v531_v9, %v521_v11  ;;  %vm2287_vm6 = vcmp.eq.s32.totalorder %v552_v7, 1 }
 0x378   : > { %v535_v13 = vmul.f32 0.70710677, %v533_v12  ;;  %v534_v19 = vmul.f32 0.5, %v533_v12 }
 0x37a   : > { %1711 = verf.f32 %v535_v13  ;;  %v1587_v13 = vld [vmem:[%s2649_s9 + $0x7] ss:$8 sm:$0x3] }
 0x37b   : > { %vm787_vm7 = vcmp.ne.f32.partialorder %v1587_v13, 0.0 }
 0x384   : > { %v1712_v17 = vpop.eup %1711 }
 0x385   : > { %v537_v20 = vadd.f32 1.0, %v1712_v17  ;;  %v626_v17 = vrot.slane %v618_v8, %v2184_v62 }
 0x387   : > { %v538_v21 = vmul.f32 %v537_v20, %v534_v19  ;;  %vm2305_vm12 = vcmp.eq.s32.totalorder %v626_v17, 1 }
 0x389   : > { %539 = vst [vmem:[#allocation2 + $0x4] sm:$0xff] %v538_v21  ;;  %v841_v22 = vcombine.high %v538_v21, %v538_v21  ;;  %v705_v23 = vsel %vm700_vm4, %v538_v21, 0.0  ;;  %vm713_vm4 = vcmp.ne.f32.partialorder %v1585_v5, 0.0 }
 0x38a   : > { %707 = vst [vmem:[#allocation3 + $0x20] sm:$0xf] %v705_v23 }
 0x38b   : > { %v706_v24 = vsel %vm701_vm5, %v841_v22, 0.0  ;;  %vm2283_vm5 = vcmp.eq.s32.totalorder %v548_v4, 1 }
 0x38c   : > { %708 = vst [vmem:[#allocation3 + $0x28] sm:$0xf] %v706_v24 }
 0x390   : > { %v574_v25 = vld [vmem:[#allocation2 + $0x8] sm:$0xf]  ;;  %v573_v26 = vld [vmem:[#allocation2] sm:$0xff] }
 0x391   : > { %596 = vrot.lane.b32.xlu1 %v574_v25, %s1882_s21  ;;  %592 = vrot.lane.b32.xlu0 %v573_v26, %s1882_s21  ;;  %v648_v27 = vld [vmem:[#allocation2 + $0x8] sm:$0xf]  ;;  %v591_v28 = vcombine.high %v573_v26, %v573_v26  ;;  %v714_v25 = vsel %vm713_vm4, 1, %v1886_v46 }
 0x392   : > { %v541_v29 = vld [vmem:[#allocation2 + $0x8] sm:$0xf]  ;;  %v722_v37 = vrot.slane %v714_v25, %v2184_v62 }
 0x393   : > { %v614_v30 = vld [vmem:[#allocation2 + $0x8] sm:$0xf] }
 0x395   : > { %670 = vrot.lane.b32.xlu1 %v648_v27, %s2660_s23  ;;  %558 = vrot.lane.b32.xlu0 %v573_v26, %s2658_s20 }
 0x399   : > { %666 = vrot.lane.b32.xlu1 %v573_v26, %s2660_s23  ;;  %728 = vrot.lane.b32.xlu0 %v538_v21, %s1885_s29 }
 0x39d   : > { %562 = vrot.lane.b32.xlu1 %v541_v29, %s2658_s20  ;;  %594 = vrot.lane.b32.xlu0 %v591_v28, %s1882_s21 }
 0x3a1   : > { %636 = vrot.lane.b32.xlu1 %v614_v30, %s2656_s24  ;;  %668 = vrot.lane.b32.xlu0 %v591_v28, %s2660_s23  ;;  %s2702_s23 = smov 1  }
 0x3a5   : > { %632 = vrot.lane.b32.xlu1 %v573_v26, %s2656_s24  ;;  %560 = vrot.lane.b32.xlu0 %v591_v28, %s2658_s20  ;;  %v1586_v26 = vld [vmem:[%s2649_s9 + $0x6] ss:$8 sm:$0x3]  ;;  %s2703_s20 = smov 17  }
 0x3a9   : > { %802 = vrot.lane.b32.xlu1 %v538_v21, %s1887_s30  ;;  %634 = vrot.lane.b32.xlu0 %v591_v28, %s2656_s24 }
 0x3ad   : > { %844 = vrot.lane.b32.xlu1 %v841_v22, %s2662_s22  ;;  %730 = vrot.lane.b32.xlu0 %v841_v22, %s1885_s29 }
 0x3b1   : > { %842 = vrot.lane.b32.xlu1 %v538_v21, %s2662_s22  ;;  %804 = vrot.lane.b32.xlu0 %v841_v22, %s1887_s30 }
 0x3b5   : > { %770 = vrot.lane.b32.xlu0 %v841_v22, %s2664_s11 }
 0x3b9   : > { %768 = vrot.lane.b32.xlu0 %v538_v21, %s2664_s11 }
 0x3bd   : > { %846 = vrot.lane.b32.xlu0 %v824_v31, %s2662_s22  ;;  %s2704_s22 = smov 15  }
 0x3c1   : > { %871 = vperm.xlu0 %1705, %v868_v33   ;;  %v718_v33 = vrot.slane %v714_v25, %v2182_v61 }
 0x3c3   : > { %vm723_vm4 = vcmp.eq.s32.totalorder %v718_v33, 1 }
 0x403   : > { %v593_v38 = vpop.permute.xlu0 %592  ;;  %v597_v39 = vpop.permute.xlu1 %596 }
 0x407   : > { %v559_v41 = vpop.permute.xlu0 %558  ;;  %v671_v42 = vpop.permute.xlu1 %670 }
 0x40b   : > { %v2245_v49 = vpop.permute.xlu0 %728  ;;  %v667_v50 = vpop.permute.xlu1 %666 }
 0x40f   : > { %v595_v55 = vpop.permute.xlu0 %594  ;;  %v563_v56 = vpop.permute.xlu1 %562 }
 0x410   : > { %v599_v57 = vsel %vm598_vm9, %v593_v38, %v595_v55  ;;  %v600_v58 = vsel %vm598_vm9, %v595_v55, %v597_v39  ;;  %v788_v38 = vsel %vm787_vm7, 1, %v1886_v46 }
 0x411   : > { %v603_v60 = vsel %vm587_vm10, %v599_v57, 0.0  ;;  %v604_v63 = vsel %vm588_vm11, %v600_v58, 0.0  ;;  %vm827_vm10 = vcmp.ne.f32.partialorder %v1588_v18, 0.0  ;;  %vm2301_vm11 = vcmp.eq.s32.totalorder %v622_v16, 1 }
 0x412   : > { %v607_v2 = vrot.slane %v603_v60, 4  ;;  %v608_v6 = vrot.slane %v604_v63, 4  ;;  %v792_v47 = vrot.slane %v788_v38, %v2182_v61 }
 0x413   : > { %v669_v9 = vpop.permute.xlu0 %668  ;;  %v637_v10 = vpop.permute.xlu1 %636 }
 0x414   : > { %611 = vst [vmem:[#allocation3] sm:$0xf0] %v607_v2  ;;  %612 = vst [vmem:[#allocation3 + $0x8] sm:$0xf0] %v608_v6  ;;  %v673_v11 = vsel %vm672_vm14, %v667_v50, %v669_v9  ;;  %v674_v12 = vsel %vm672_vm14, %v669_v9, %v671_v42  ;;  %v796_v50 = vrot.slane %v788_v38, %v2184_v62  ;;  %vm2332_vm7 = vcmp.eq.s32.totalorder %v792_v47, 1 }
 0x415   : > { %v677_v14 = vsel %vm2255_vm13, %v673_v11, 0.0  ;;  %v678_v15 = vsel %vm2259_vm15, %v674_v12, 0.0  ;;  %vm753_vm13 = vcmp.ne.f32.partialorder %v1586_v26, 0.0  ;;  %vm734_vm15 = vcmask 1039360   ;;  %v857_v38 = vld [vmem:[%s2643_s3] sm:$0xf] }
 0x416   : > { %v681_v19 = vrot.slane %v677_v14, 4  ;;  %v682_v20 = vrot.slane %v678_v15, 4  ;;  %v754_v48 = vsel %vm753_vm13, 1, %v1886_v46  ;;  %vm774_vm13 = vcmask 924672  }
 0x417   : > { %v561_v23 = vpop.permute.xlu0 %560  ;;  %v633_v24 = vpop.permute.xlu1 %632 }
 0x418   : > { %685 = vst [vmem:[#allocation3 + $0x10] sm:$0xf0] %v681_v19  ;;  %686 = vst [vmem:[#allocation3 + $0x18] sm:$0xf0] %v682_v20  ;;  %v565_v27 = vsel %vm564_vm3, %v559_v41, %v561_v23  ;;  %v566_v28 = vsel %vm564_vm3, %v561_v23, %v563_v56  ;;  %v2314_v41 = vsel %vm827_vm10, 1, %v1886_v46  ;;  %v762_v56 = vrot.slane %v754_v48, %v2184_v62 }
 0x419   : > { %v569_v29 = vsel %vm2283_vm5, %v565_v27, 0.0  ;;  %v570_v30 = vsel %vm2287_vm6, %v566_v28, 0.0  ;;  %vm724_vm5 = vcmp.eq.s32.totalorder %v722_v37, 1  ;;  %v832_v51 = vrot.slane %v2314_v41, %v2182_v61 }
 0x41a   : > { %571 = vst [vmem:[#allocation3] sm:$0xf] %v569_v29  ;;  %572 = vst [vmem:[#allocation3 + $0x8] sm:$0xf] %v570_v30  ;;  %vm808_vm6 = vcmask 916480   ;;  %vm848_vm10 = vcmask 908288   ;;  %v836_v22 = vrot.slane %v2314_v41, %v2184_v62 }
 0x41b   : > { %v635_v39 = vpop.permute.xlu0 %634  ;;  %v803_v40 = vpop.permute.xlu1 %802 }
 0x41c   : > { %v639_v42 = vsel %vm638_vm8, %v633_v24, %v635_v39  ;;  %v640_v43 = vsel %vm638_vm8, %v635_v39, %v637_v10 }
 0x41d   : > { %v643_v44 = vsel %vm2301_vm11, %v639_v42, 0.0  ;;  %v644_v45 = vsel %vm2305_vm12, %v640_v43, 0.0  ;;  %vm2336_vm11 = vcmp.eq.s32.totalorder %v796_v50, 1  ;;  %vm2340_vm12 = vcmp.eq.s32.totalorder %v832_v51, 1 }
 0x41e   : > { %645 = vst [vmem:[#allocation3 + $0x10] sm:$0xf] %v643_v44  ;;  %646 = vst [vmem:[#allocation3 + $0x18] sm:$0xf] %v644_v45 }
 0x41f   : > { %v731_v52 = vpop.permute.xlu0 %730  ;;  %v845_v53 = vpop.permute.xlu1 %844 }
 0x420   : > { %v735_v54 = vsel %vm734_vm15, %v2245_v49, %v731_v52  ;;  %v736_v55 = vsel %vm734_vm15, %v731_v52, %v2226_v34 }
 0x421   : > { %v739_v57 = vsel %vm723_vm4, %v735_v54, 0.0  ;;  %v740_v58 = vsel %vm724_vm5, %v736_v55, 0.0  ;;  %vm2348_vm4 = vcmp.eq.s32.totalorder %v762_v56, 1  ;;  %v859_v8 = vld [vmem:[#allocation3 + $0x8] sm:$0xff]  ;;  %v858_v13 = vld [vmem:[#allocation3] sm:$0xff] }
 0x422   : > { %v743_v60 = vrot.slane %v739_v57, 4  ;;  %v744_v63 = vrot.slane %v740_v58, 4 }
 0x423   : > { %v805_v34 = vpop.permute.xlu0 %804  ;;  %v843_v4 = vpop.permute.xlu1 %842 }
 0x424   : > { %747 = vst [vmem:[#allocation3 + $0x20] sm:$0xf0] %v743_v60  ;;  %748 = vst [vmem:[#allocation3 + $0x28] sm:$0xf0] %v744_v63  ;;  %v809_v5 = vsel %vm808_vm6, %v803_v40, %v805_v34  ;;  %v810_v2 = vsel %vm808_vm6, %v805_v34, %v2228_v35  ;;  %v849_v6 = vsel %vm848_vm10, %v843_v4, %v845_v53 }
 0x425   : > { %v813_v9 = vsel %vm2332_vm7, %v809_v5, 0.0  ;;  %v814_v10 = vsel %vm2336_vm11, %v810_v2, 0.0  ;;  %v853_v11 = vsel %vm2340_vm12, %v849_v6, 0.0  ;;  %v861_v12 = vld [vmem:[#allocation3 + $0x18] sm:$0xff]  ;;  %v860_v14 = vld [vmem:[#allocation3 + $0x10] sm:$0xff]  ;;  %v758_v35 = vrot.slane %v754_v48, %v2182_v61 }
 0x426   : > { %v817_v15 = vrot.slane %v813_v9, 4  ;;  %v818_v16 = vrot.slane %v814_v10, 4  ;;  %855 = vst [vmem:[#allocation3 + $0x40] sm:$0xf] %v853_v11  ;;  %v1610_v17 = vpack.c.bf16 %v861_v12, %v859_v8  ;;  %v1612_v18 = vpack.c.bf16 %v860_v14, %v858_v13 }
 0x427   : > { %v771_v19 = vpop.permute.xlu0 %770  ;;  %vm763_vm5 = vcmp.eq.s32.totalorder %v758_v35, 1  ;;  %vm838_vm7 = vcmp.eq.s32.totalorder %v836_v22, 1  ;;  %vm878_vm11 = vcmask 1043456   ;;  %vm874_vm12 = vcmask 293888   ;;  %v1259_v22 = vld [vmem:[#allocation2 + $0xc] sm:$0xf] }
 0x428   : > { %821 = vst [vmem:[#allocation3 + $0x30] sm:$0xf0] %v817_v15  ;;  %822 = vst [vmem:[#allocation3 + $0x38] sm:$0xf0] %v818_v16  ;;  %v776_v20 = vsel %vm774_vm13, %v771_v19, %v2230_v36  ;;  %1611 = vmatprep.subr.bf16.mxu0 %v1610_v17 }
 0x429   : > { %v780_v21 = vsel %vm2348_vm4, %v776_v20, 0.0  ;;  %1613 = vmatpush1.bf16.msra.mxu0 %v1612_v18  ;;  %v1221_v20 = vld [vmem:[#allocation2 + $0xc] sm:$0xf] }
 0x42a   : > { %782 = vst [vmem:[#allocation3 + $0x38] sm:$0xf] %v780_v21  ;;  %v1291_v21 = vld [vmem:[#allocation2 + $0xc] sm:$0xf] }
 0x42b   : > { %v769_v23 = vpop.permute.xlu0 %768  ;;  %v863_v28 = vld [vmem:[#allocation3 + $0x28] sm:$0xff]  ;;  %v862_v31 = vld [vmem:[#allocation3 + $0x20] sm:$0xff] }
 0x42c   : > { %v775_v24 = vsel %vm774_vm13, %v769_v23, %v771_v19 }
 0x42d   : > { %v779_v25 = vsel %vm763_vm5, %v775_v24, 0.0  ;;  %v866_v39 = vld [vmem:[#allocation3 + $0x40] sm:$0xf] }
 0x42e   : > { %781 = vst [vmem:[#allocation3 + $0x30] sm:$0xf] %v779_v25 }
 0x42f   : > { %v847_v26 = vpop.permute.xlu0 %846 }
 0x430   : > { %v850_v27 = vsel %vm848_vm10, %v845_v53, %v847_v26 }
 0x431   : > { %v854_v36 = vsel %vm838_vm7, %v850_v27, 0.0  ;;  %v865_v29 = vld [vmem:[#allocation3 + $0x38] sm:$0xff] }
 0x432   : > { %856 = vst [vmem:[#allocation3 + $0x48] sm:$0xf] %v854_v36  ;;  %v1614_v30 = vpack.c.bf16 %v865_v29, %v863_v28 }
 0x434   : > { %1615 = vmatprep.subr.bf16.mxu0 %v1614_v30 }
 0x435   : > { %v864_v32 = vld [vmem:[#allocation3 + $0x30] sm:$0xff] }
 0x436   : > { %v1616_v33 = vpack.c.bf16 %v864_v32, %v862_v31  ;;  %v956_v31 = vld [vmem:[#allocation7] sm:$0x3]  ;;  %v957_v32 = vld [vmem:[#allocation9] sm:$0x3] }
 0x438   : > { %1617 = vmatpush1.bf16.msra.mxu0 %v1616_v33  ;;  %v1022_v33 = vrot.slane %v956_v31, %v2182_v61 }
 0x439   : > { %v867_v37 = vld [vmem:[#allocation3 + $0x48] sm:$0xf] }
 0x43a   : > { %1589 = vmatprep.subr.msk.mxu0 %vm878_vm11, %v867_v37  ;;  %v1026_v37 = vrot.slane %v956_v31, %v2184_v62 }
 0x43c   : > { %1590 = vmatpush1.msk.msra.mxu0 %vm878_vm11, %v866_v39  ;;  %v1035_v39 = vrot.slane %v957_v32, %v2182_v61 }
 0x43d   : > { %1591 = vmatmul.mubr.msk.f32.vlgmr.msra.gmra.mrb[0].mxu0 %vm874_vm12, %v857_v38 }
 0x440   : > { %v872_v40 = vpop.permute.xlu0 %871 }
 0x510   : > { %v951_v41 = vpop.f32.mrb[0].mxu0 }
 0x511   : > { %v952_v42 = vadd.f32 %v951_v41, %v872_v40  ;;  %v953_v43 = vpop.f32.mrb[1].mxu0 }
 0x512   : > { %v954_v44 = vadd.f32 %v953_v43, %v872_v40  ;;  %v1039_v40 = vrot.slane %v957_v32, %v2184_v62 }
 0x513   : > { %958 = vrot.lane.b32.xlu1 %v952_v42, %s1882_s21 }
 0x517   : > { %960 = vrot.lane.b32.xlu1 %v954_v44, %s1882_s21 }
 0x585   : > { %v959_v45 = vpop.permute.xlu1 %958 }
 0x589   : > { %v961_v47 = vpop.permute.xlu1 %960 }
 0x58a   : > { %v962_v48 = vsel %vm413_vm0, %v959_v45, %v961_v47  ;;  %v963_v50 = vsel %vm413_vm0, %v961_v47, %v959_v45 }
 0x58b   : > { %v964_v51 = vadd.f32 %v963_v50, %v952_v42  ;;  %v965_v52 = vadd.f32 %v962_v48, %v954_v44  ;;  %v1595_v50 = vld [vmem:[%s2649_s9 + $0x4] ss:$8 sm:$0x3] }
 0x58d   : > { %966 = vrot.lane.b32.xlu0 %v964_v51, %s1883_s19  ;;  %968 = vrot.lane.b32.xlu1 %v965_v52, %s1883_s19 }
 0x5ff   : > { %v967_v53 = vpop.permute.xlu0 %966  ;;  %v969_v54 = vpop.permute.xlu1 %968 }
 0x600   : > { %v970_v55 = vsel %vm428_vm1, %v967_v53, %v969_v54  ;;  %v971_v56 = vsel %vm428_vm1, %v969_v54, %v967_v53 }
 0x601   : > { %v972_v57 = vadd.f32 %v971_v56, %v964_v51  ;;  %v973_v58 = vadd.f32 %v970_v55, %v965_v52 }
 0x603   : > { %974 = vrot.lane.b32.xlu0 %v972_v57, %s1884_s25  ;;  %976 = vrot.lane.b32.xlu1 %v973_v58, %s1884_s25 }
 0x675   : > { %v975_v59 = vpop.permute.xlu0 %974  ;;  %v977_v60 = vpop.permute.xlu1 %976 }
 0x676   : > { %v978_v63 = vsel %vm443_vm2, %v975_v59, %v977_v60  ;;  %v979_v0 = vsel %vm443_vm2, %v977_v60, %v975_v59 }
 0x677   : > { %v980_v49 = vadd.f32 %v979_v0, %v972_v57  ;;  %v981_v34 = vadd.f32 %v978_v63, %v973_v58 }
 0x679   : > { %v982_v4 = vadd.f32 %v981_v34, %v980_v49 }
 0x67b   : > { %v983_v5 = vmul.f32 0.0625, %v982_v4 }
 0x67d   : > { %v985_v2 = vsub.f32 %v954_v44, %v983_v5  ;;  %v984_v6 = vsub.f32 %v952_v42, %v983_v5 }
 0x67f   : > { %v987_v7 = vmul.f32 %v985_v2, %v985_v2  ;;  %v986_v8 = vmul.f32 %v984_v6, %v984_v6 }
 0x681   : > { %990 = vrot.lane.b32.xlu1 %v987_v7, %s1882_s21  ;;  %988 = vrot.lane.b32.xlu0 %v986_v8, %s1882_s21 }
 0x6f3   : > { %v991_v9 = vpop.permute.xlu1 %990  ;;  %v989_v10 = vpop.permute.xlu0 %988 }
 0x6f4   : > { %v992_v11 = vsel %vm413_vm0, %v989_v10, %v991_v9  ;;  %v993_v12 = vsel %vm413_vm0, %v991_v9, %v989_v10  ;;  %vm1201_vm0 = vcmp.ne.f32.partialorder %v1595_v50, 0.0  ;;  %v1329_v10 = vld [vmem:[#allocation2 + $0xc] sm:$0xf] }
 0x6f5   : > { %v994_v13 = vadd.f32 %v993_v12, %v986_v8  ;;  %v995_v14 = vadd.f32 %v992_v11, %v987_v7  ;;  %v1202_v51 = vsel %vm1201_vm0, 1, %v1886_v46  ;;  %v1371_v11 = vld [vmem:[%s2648_s8] sm:$0xf] }
 0x6f6   : > { %v1206_v56 = vrot.slane %v1202_v51, %v2182_v61  ;;  %v1210_v60 = vrot.slane %v1202_v51, %v2184_v62 }
 0x6f7   : > { %996 = vrot.lane.b32.xlu0 %v994_v13, %s1883_s19  ;;  %998 = vrot.lane.b32.xlu1 %v995_v14, %s1883_s19  ;;  %s2701_s19 = smov 113  }
 0x769   : > { %v997_v35 = vpop.permute.xlu0 %996  ;;  %v999_v15 = vpop.permute.xlu1 %998 }
 0x76a   : > { %v1000_v16 = vsel %vm428_vm1, %v997_v35, %v999_v15  ;;  %v1001_v17 = vsel %vm428_vm1, %v999_v15, %v997_v35  ;;  %vm1211_vm1 = vcmp.eq.s32.totalorder %v1206_v56, 1  ;;  %v1592_v35 = vld [vmem:[%s2649_s9 + $0x1] ss:$8 sm:$0x3] }
 0x76b   : > { %v1002_v18 = vadd.f32 %v1001_v17, %v994_v13  ;;  %v1003_v19 = vadd.f32 %v1000_v16, %v995_v14  ;;  %v1594_v17 = vld [vmem:[%s2649_s9 + $0x3] ss:$8 sm:$0x3]  ;;  %vm1094_vm4 = vcmp.ne.f32.partialorder %v1592_v35, 0.0 }
 0x76c   : > { %vm1164_vm5 = vcmp.ne.f32.partialorder %v1594_v17, 0.0 }
 0x76d   : > { %1004 = vrot.lane.b32.xlu0 %v1002_v18, %s1884_s25  ;;  %1006 = vrot.lane.b32.xlu1 %v1003_v19, %s1884_s25 }
 0x771   : > { %1242 = vrot.lane.b32.xlu1 %v1221_v20, %s1885_s29  ;;  %v1095_v20 = vsel %vm1094_vm4, 1, %v1886_v46 }
 0x775   : > { %1312 = vrot.lane.b32.xlu1 %v1291_v21, %s1887_s30  ;;  %v1061_v21 = vld [vmem:[%s2649_s9] ss:$8 sm:$0x3] }
 0x776   : > { %vm1062_vm7 = vcmp.ne.f32.partialorder %v1061_v21, 0.0 }
 0x779   : > { %1280 = vrot.lane.b32.xlu1 %v1259_v22, %s2701_s19  ;;  %v1165_v22 = vsel %vm1164_vm5, 1, %v1886_v46 }
 0x7df   : > { %v1005_v23 = vpop.permute.xlu0 %1004  ;;  %v1007_v24 = vpop.permute.xlu1 %1006 }
 0x7e0   : > { %v1008_v25 = vsel %vm443_vm2, %v1005_v23, %v1007_v24  ;;  %v1009_v26 = vsel %vm443_vm2, %v1007_v24, %v1005_v23  ;;  %vm1212_vm2 = vcmp.eq.s32.totalorder %v1210_v60, 1  ;;  %v1099_v23 = vrot.slane %v1095_v20, %v2182_v61 }
 0x7e1   : > { %v1010_v27 = vadd.f32 %v1009_v26, %v1002_v18  ;;  %v1011_v36 = vadd.f32 %v1008_v25, %v1003_v19  ;;  %v1103_v24 = vrot.slane %v1095_v20, %v2184_v62 }
 0x7e2   : > { %vm1104_vm0 = vcmp.eq.s32.totalorder %v1099_v23, 1 }
 0x7e3   : > { %v1012_v28 = vadd.f32 %v1011_v36, %v1010_v27  ;;  %v2446_v12 = vpop.permute.xlu1 %1242  ;;  %v1169_v27 = vrot.slane %v1165_v22, %v2182_v61  ;;  %v1593_v36 = vld [vmem:[%s2649_s9 + $0x2] ss:$8 sm:$0x3] }
 0x7e5   : > { %v1013_v29 = vmul.f32 0.0625, %v1012_v28  ;;  %v1173_v28 = vrot.slane %v1165_v22, %v2184_v62  ;;  %vm2475_vm4 = vcmp.eq.s32.totalorder %v1169_v27, 1 }
 0x7e7   : > { %v1014_v30 = vadd.f32 1e-05, %v1013_v29  ;;  %v2448_v13 = vpop.permute.xlu1 %1312  ;;  %v1063_v29 = vsel %vm1062_vm7, 1, %v1886_v46  ;;  %vm2479_vm5 = vcmp.eq.s32.totalorder %v1173_v28, 1 }
 0x7e9   : > { %1713 = vrsqrt.f32 %v1014_v30 }
 0x7eb   : > { %v2450_v14 = vpop.permute.xlu1 %1280 }
 0x7f3   : > { %v1714_v38 = vpop.eup %1713 }
 0x7f4   : > { %v1016_v41 = vmul.f32 %v1714_v38, %v984_v6  ;;  %v1017_v3 = vmul.f32 %v1714_v38, %v985_v2 }
 0x7f6   : > { %v1029_v42 = vmul.f32 %v1022_v33, %v1016_v41  ;;  %v1030_v43 = vmul.f32 %v1026_v37, %v1017_v3  ;;  %v1067_v41 = vrot.slane %v1063_v29, %v2182_v61  ;;  %v1596_v3 = vld [vmem:[%s2649_s9 + $0x5] ss:$8 sm:$0x3] }
 0x7f8   : > { %v1042_v44 = vadd.f32 %v1035_v39, %v1029_v42  ;;  %v1043_v45 = vadd.f32 %v1039_v40, %v1030_v43 }
 0x7fa   : > { %v1046_v47 = vmul.f32 0.70710677, %v1042_v44  ;;  %v1047_v48 = vmul.f32 0.70710677, %v1043_v45  ;;  %v1044_v54 = vmul.f32 0.5, %v1042_v44  ;;  %v1045_v57 = vmul.f32 0.5, %v1043_v45 }
 0x7fb   : > { %v1071_v44 = vrot.slane %v1063_v29, %v2184_v62 }
 0x7fc   : > { %1715 = verf.f32 %v1046_v47 }
 0x7fd   : > { %1717 = verf.f32 %v1047_v48  ;;  %vm2507_vm7 = vcmp.eq.s32.totalorder %v1071_v44, 1 }
 0x806   : > { %v1716_v52 = vpop.eup %1715 }
 0x807   : > { %v1718_v53 = vpop.eup %1717  ;;  %v1050_v55 = vadd.f32 1.0, %v1716_v52  ;;  %v1598_v52 = vld [vmem:[%s2649_s9 + $0x7] ss:$8 sm:$0x3] }
 0x808   : > { %v1051_v58 = vadd.f32 1.0, %v1718_v53 }
 0x809   : > { %v1052_v59 = vmul.f32 %v1050_v55, %v1044_v54 }
 0x80a   : > { %v1053_v63 = vmul.f32 %v1051_v58, %v1045_v57  ;;  %v1599_v57 = vld [vmem:[%s2649_s9 + $0x10] ss:$8 sm:$0x3] }
 0x80c   : > { %v1056_v0 = vcombine.low %v1052_v59, %v1053_v63  ;;  %v1720_v49 = vcombine.low %v1053_v63, %v1053_v63 }
 0x80e   : > { %1058 = vst [vmem:[#allocation2 + $0x4] sm:$0xff] %v1056_v0  ;;  %v1216_v34 = vsel %vm1211_vm1, %v1056_v0, 0.0  ;;  %v1217_v4 = vsel %vm1212_vm2, %v1720_v49, 0.0  ;;  %vm1105_vm1 = vcmp.eq.s32.totalorder %v1103_v24, 1  ;;  %vm1132_vm2 = vcmp.ne.f32.partialorder %v1593_v36, 0.0 }
 0x80f   : > { %1218 = vst [vmem:[#allocation3 + $0x20] sm:$0xf] %v1216_v34  ;;  %1219 = vst [vmem:[#allocation3 + $0x28] sm:$0xf] %v1217_v4  ;;  %v1133_v45 = vsel %vm1132_vm2, 1, %v1886_v46 }
 0x810   : > { %v1137_v55 = vrot.slane %v1133_v45, %v2182_v61  ;;  %v1141_v56 = vrot.slane %v1133_v45, %v2184_v62  ;;  %v1597_v4 = vld [vmem:[%s2649_s9 + $0x6] ss:$8 sm:$0x3] }
 0x812   : > { %vm2521_vm2 = vcmp.eq.s32.totalorder %v1137_v55, 1 }
 0x815   : > { %v1092_v5 = vld [vmem:[#allocation2 + $0x8] sm:$0xf]  ;;  %v1091_v2 = vld [vmem:[#allocation2] sm:$0xff] }
 0x816   : > { %1113 = vrot.lane.b32.xlu1 %v1092_v5, %s1882_s21  ;;  %1109 = vrot.lane.b32.xlu0 %v1091_v2, %s1882_s21  ;;  %v1162_v6 = vld [vmem:[#allocation2 + $0x8] sm:$0xf]  ;;  %v1108_v7 = vcombine.high %v1091_v2, %v1091_v2 }
 0x817   : > { %v1060_v8 = vld [vmem:[#allocation2 + $0x8] sm:$0xf] }
 0x818   : > { %v1130_v9 = vld [vmem:[#allocation2 + $0x8] sm:$0xf] }
 0x81a   : > { %1183 = vrot.lane.b32.xlu1 %v1162_v6, %s2702_s23  ;;  %1077 = vrot.lane.b32.xlu0 %v1091_v2, %s2703_s20 }
 0x81e   : > { %1179 = vrot.lane.b32.xlu1 %v1091_v2, %s2702_s23  ;;  %1238 = vrot.lane.b32.xlu0 %v1056_v0, %s1885_s29 }
 0x822   : > { %1081 = vrot.lane.b32.xlu1 %v1060_v8, %s2703_s20  ;;  %1111 = vrot.lane.b32.xlu0 %v1108_v7, %s1882_s21  ;;  %v1360_v8 = vld [vmem:[%s2647_s7] sm:$0xf] }
 0x826   : > { %1151 = vrot.lane.b32.xlu1 %v1130_v9, %s2704_s22  ;;  %1181 = vrot.lane.b32.xlu0 %v1108_v7, %s2702_s23 }
 0x82a   : > { %1147 = vrot.lane.b32.xlu1 %v1091_v2, %s2704_s22  ;;  %1079 = vrot.lane.b32.xlu0 %v1108_v7, %s2703_s20 }
 0x82e   : > { %1308 = vrot.lane.b32.xlu1 %v1056_v0, %s1887_s30  ;;  %1149 = vrot.lane.b32.xlu0 %v1108_v7, %s2704_s22  ;;  %s1609_s22 = sshll.u32 %s1971_s17, 7  ;;  %s1894_s17 = smov [#allocation10]  }
 0x82f   : > { %s1811_s11 = sshll.u32 %s1894_s17, 4  ;;  %s1812_s11 = int_to_ptr.vmem [resolvable:$false] %s1811_s11 }
 0x830   : > { %s1813_s23 = scalar_lea.vmem %s1812_s11, 256 }
 0x832   : > { %1348 = vrot.lane.b32.xlu1 %v1720_v49, %s2705_s28  ;;  %1240 = vrot.lane.b32.xlu0 %v1720_v49, %s1885_s29 }
 0x836   : > { %1346 = vrot.lane.b32.xlu1 %v1056_v0, %s2705_s28  ;;  %1310 = vrot.lane.b32.xlu0 %v1720_v49, %s1887_s30 }
 0x83a   : > { %1278 = vrot.lane.b32.xlu0 %v1720_v49, %s2701_s19 }
 0x83e   : > { %1276 = vrot.lane.b32.xlu0 %v1056_v0, %s2701_s19  ;;  %s2596_s19 = scalar_lea.hbm %s2650_s10, %s1609_s22 }
 0x842   : > { %1350 = vrot.lane.b32.xlu0 %v1329_v10, %s2705_s28  ;;  %s2726_s28 = sshll.u32 %s2115_s5, 3 }
 0x843   : > { %s400_s21 = scalar_lea.vmem [#allocation10], %s2726_s28 }
 0x844   : > { %s1479_s24 = sshll.u32 %s400_s21, 4  ;;  %s2598_s24 = int_to_ptr.vmem [resolvable:$true] %s1479_s24 }
 0x845   : > { %s1807_s25 = scalar_lea.vmem %s2598_s24, 128  ;;  %p1814_p8 = scmp.lt.s32.totalorder %s2598_s24, %s1812_s11 }
 0x846   : > { %1374 = vperm.xlu0 %1705, %v1371_v11   ;;  %p1808_p2 = scmp.ne.s32.totalorder %s2598_s24, %s1807_s25  ;;  %p1815_p12 = scmp.lt.s32.totalorder %s1813_s23, %s1807_s25 }
 0x848   : > { %p1809_p1 = pnand %p1808_p2, %p2069_p6  ;;  %p1816_p3 = por %p1815_p12, %p1814_p8 }
 0x84a   : > { %p1810_p4 = pneg %p1809_p1 }
 0x84c   : > { %p1817_p7 = pnand %p1816_p3, %p1810_p4 }
 0x888   : > { %v1110_v15 = vpop.permute.xlu0 %1109  ;;  %v1114_v16 = vpop.permute.xlu1 %1113 }
 0x88c   : > { %v1078_v18 = vpop.permute.xlu0 %1077  ;;  %v1184_v19 = vpop.permute.xlu1 %1183 }
 0x890   : > { %v2465_v25 = vpop.permute.xlu0 %1238  ;;  %v1180_v26 = vpop.permute.xlu1 %1179 }
 0x894   : > { %v1112_v30 = vpop.permute.xlu0 %1111  ;;  %v1082_v31 = vpop.permute.xlu1 %1081 }
 0x895   : > { %v1115_v32 = vsel %vm598_vm9, %v1110_v15, %v1112_v30  ;;  %v1116_v33 = vsel %vm598_vm9, %v1112_v30, %v1114_v16  ;;  %vm1223_vm9 = vcmp.ne.f32.partialorder %v1596_v3, 0.0 }
 0x896   : > { %v1119_v38 = vsel %vm1104_vm0, %v1115_v32, 0.0  ;;  %v1120_v39 = vsel %vm1105_vm1, %v1116_v33, 0.0  ;;  %v1224_v34 = vsel %vm1223_vm9, 1, %v1886_v46  ;;  %vm1293_vm0 = vcmp.ne.f32.partialorder %v1598_v52, 0.0 }
 0x897   : > { %v1123_v42 = vrot.slane %v1119_v38, 4  ;;  %v1124_v43 = vrot.slane %v1120_v39, 4  ;;  %vm1331_vm1 = vcmp.ne.f32.partialorder %v1599_v57, 0.0  ;;  %v1228_v10 = vrot.slane %v1224_v34, %v2182_v61 }
 0x898   : > { %v1182_v47 = vpop.permute.xlu0 %1181  ;;  %v1152_v48 = vpop.permute.xlu1 %1151  ;;  %v1232_v11 = vrot.slane %v1224_v34, %v2184_v62  ;;  %v1294_v35 = vsel %vm1293_vm0, 1, %v1886_v46  ;;  %v1332_v17 = vsel %vm1331_vm1, 1, %v1886_v46 }
 0x899   : > { %1127 = vst [vmem:[#allocation3] sm:$0xf0] %v1123_v42  ;;  %1128 = vst [vmem:[#allocation3 + $0x8] sm:$0xf0] %v1124_v43  ;;  %v1185_v50 = vsel %vm672_vm14, %v1180_v26, %v1182_v47  ;;  %v1186_v51 = vsel %vm672_vm14, %v1182_v47, %v1184_v19  ;;  %vm2503_vm14 = vcmp.eq.s32.totalorder %v1067_v41, 1  ;;  %v1298_v22 = vrot.slane %v1294_v35, %v2182_v61 }
 0x89a   : > { %v1189_v53 = vsel %vm2475_vm4, %v1185_v50, 0.0  ;;  %v1190_v54 = vsel %vm2479_vm5, %v1186_v51, 0.0  ;;  %vm2525_vm4 = vcmp.eq.s32.totalorder %v1141_v56, 1  ;;  %vm1233_vm5 = vcmp.eq.s32.totalorder %v1228_v10, 1 }
 0x89b   : > { %v1193_v58 = vrot.slane %v1189_v53, 4  ;;  %v1194_v59 = vrot.slane %v1190_v54, 4  ;;  %vm1234_vm9 = vcmp.eq.s32.totalorder %v1232_v11, 1  ;;  %v1302_v24 = vrot.slane %v1294_v35, %v2184_v62 }
 0x89c   : > { %v1080_v0 = vpop.permute.xlu0 %1079  ;;  %v1148_v49 = vpop.permute.xlu1 %1147  ;;  %v1336_v26 = vrot.slane %v1332_v17, %v2182_v61 }
 0x89d   : > { %1197 = vst [vmem:[#allocation3 + $0x10] sm:$0xf0] %v1193_v58  ;;  %1198 = vst [vmem:[#allocation3 + $0x18] sm:$0xf0] %v1194_v59  ;;  %v1083_v5 = vsel %vm564_vm3, %v1078_v18, %v1080_v0  ;;  %v1084_v2 = vsel %vm564_vm3, %v1080_v0, %v1082_v31  ;;  %vm1261_vm3 = vcmp.ne.f32.partialorder %v1597_v4, 0.0 }
 0x89e   : > { %v1087_v6 = vsel %vm2503_vm14, %v1083_v5, 0.0  ;;  %v1088_v7 = vsel %vm2507_vm7, %v1084_v2, 0.0  ;;  %v1262_v23 = vsel %vm1261_vm3, 1, %v1886_v46  ;;  %vm2552_vm14 = vcmp.eq.s32.totalorder %v1302_v24, 1 }
 0x89f   : > { %1089 = vst [vmem:[#allocation3] sm:$0xf] %v1087_v6  ;;  %1090 = vst [vmem:[#allocation3 + $0x8] sm:$0xf] %v1088_v7  ;;  %v1270_v30 = vrot.slane %v1262_v23, %v2184_v62  ;;  %vm2556_vm7 = vcmp.eq.s32.totalorder %v1336_v26, 1 }
 0x8a0   : > { %v1150_v15 = vpop.permute.xlu0 %1149  ;;  %v1309_v16 = vpop.permute.xlu1 %1308 }
 0x8a1   : > { %v1153_v18 = vsel %vm638_vm8, %v1148_v49, %v1150_v15  ;;  %v1154_v19 = vsel %vm638_vm8, %v1150_v15, %v1152_v48  ;;  %vm2548_vm8 = vcmp.eq.s32.totalorder %v1298_v22, 1 }
 0x8a2   : > { %v1157_v20 = vsel %vm2521_vm2, %v1153_v18, 0.0  ;;  %v1158_v21 = vsel %vm2525_vm4, %v1154_v19, 0.0 }
 0x8a3   : > { %1159 = vst [vmem:[#allocation3 + $0x10] sm:$0xf] %v1157_v20  ;;  %1160 = vst [vmem:[#allocation3 + $0x18] sm:$0xf] %v1158_v21 }
 0x8a4   : > { %v1241_v27 = vpop.permute.xlu0 %1240  ;;  %v1349_v36 = vpop.permute.xlu1 %1348 }
 0x8a5   : > { %v1244_v28 = vsel %vm734_vm15, %v2465_v25, %v1241_v27  ;;  %v1245_v29 = vsel %vm734_vm15, %v1241_v27, %v2446_v12  ;;  %vm2564_vm15 = vcmp.eq.s32.totalorder %v1270_v30, 1 }
 0x8a6   : > { %v1248_v31 = vsel %vm1233_vm5, %v1244_v28, 0.0  ;;  %v1249_v46 = vsel %vm1234_vm9, %v1245_v29, 0.0  ;;  %v1362_v43 = vld [vmem:[#allocation3 + $0x8] sm:$0xff]  ;;  %v1361_v50 = vld [vmem:[#allocation3] sm:$0xff] }
 0x8a7   : > { %v1252_v33 = vrot.slane %v1248_v31, 4  ;;  %v1253_v37 = vrot.slane %v1249_v46, 4 }
 0x8a8   : > { %v1311_v25 = vpop.permute.xlu0 %1310  ;;  %v1347_v12 = vpop.permute.xlu1 %1346 }
 0x8a9   : > { %1256 = vst [vmem:[#allocation3 + $0x20] sm:$0xf0] %v1252_v33  ;;  %1257 = vst [vmem:[#allocation3 + $0x28] sm:$0xf0] %v1253_v37  ;;  %v1314_v40 = vsel %vm808_vm6, %v1309_v16, %v1311_v25  ;;  %v1315_v41 = vsel %vm808_vm6, %v1311_v25, %v2448_v13  ;;  %v1352_v3 = vsel %vm848_vm10, %v1347_v12, %v1349_v36 }
 0x8aa   : > { %v1318_v44 = vsel %vm2548_vm8, %v1314_v40, 0.0  ;;  %v1319_v45 = vsel %vm2552_vm14, %v1315_v41, 0.0  ;;  %v1356_v47 = vsel %vm2556_vm7, %v1352_v3, 0.0  ;;  %v1364_v48 = vld [vmem:[#allocation3 + $0x18] sm:$0xff]  ;;  %v1363_v51 = vld [vmem:[#allocation3 + $0x10] sm:$0xff]  ;;  %v1266_v13 = vrot.slane %v1262_v23, %v2182_v61 }
 0x8ab   : > { %v1322_v52 = vrot.slane %v1318_v44, 4  ;;  %v1323_v53 = vrot.slane %v1319_v45, 4  ;;  %1358 = vst [vmem:[#allocation3 + $0x40] sm:$0xf] %v1356_v47  ;;  %v1618_v54 = vpack.c.bf16 %v1364_v48, %v1362_v43  ;;  %v1620_v55 = vpack.c.bf16 %v1363_v51, %v1361_v50 }
 0x8ac   : > { %v1279_v56 = vpop.permute.xlu0 %1278  ;;  %vm1271_vm6 = vcmp.eq.s32.totalorder %v1266_v13, 1  ;;  %v1340_v61 = vrot.slane %v1332_v17, %v2184_v62  ;;  %v1719_v17 = vld [vmem:[%s2121_s18] sm:$0xff]  ;;  %s1465_s18 = scalar_lea.sflag [#allocation6], %s2115_s5 }
 0x8ad   : > { %1326 = vst [vmem:[#allocation3 + $0x30] sm:$0xf0] %v1322_v52  ;;  %1327 = vst [vmem:[#allocation3 + $0x38] sm:$0xf0] %v1323_v53  ;;  %v1283_v57 = vsel %vm774_vm13, %v1279_v56, %v2450_v14  ;;  %1619 = vmatprep.subr.bf16.mxu1 %v1618_v54 }
 0x8ae   : > { %v1287_v58 = vsel %vm2564_vm15, %v1283_v57, 0.0  ;;  %1621 = vmatpush1.bf16.msra.mxu1 %v1620_v55  ;;  %vm1342_vm0 = vcmp.eq.s32.totalorder %v1340_v61, 1 }
 0x8af   : > { %1289 = vst [vmem:[#allocation3 + $0x38] sm:$0xf] %v1287_v58 }
 0x8b0   : > { %v1277_v59 = vpop.permute.xlu0 %1276  ;;  %v1366_v14 = vld [vmem:[#allocation3 + $0x28] sm:$0xff]  ;;  %v1365_v2 = vld [vmem:[#allocation3 + $0x20] sm:$0xff] }
 0x8b1   : > { %v1282_v60 = vsel %vm774_vm13, %v1277_v59, %v1279_v56 }
 0x8b2   : > { %v1286_v63 = vsel %vm1271_vm6, %v1282_v60, 0.0  ;;  %v1369_v9 = vld [vmem:[#allocation3 + $0x40] sm:$0xf] }
 0x8b3   : > { %1288 = vst [vmem:[#allocation3 + $0x30] sm:$0xf] %v1286_v63 }
 0x8b4   : > { %v1351_v0 = vpop.permute.xlu0 %1350 }
 0x8b5   : > { %v1353_v49 = vsel %vm848_vm10, %v1349_v36, %v1351_v0 }
 0x8b6   : > { %v1357_v34 = vsel %vm1342_vm0, %v1353_v49, 0.0  ;;  %v1368_v4 = vld [vmem:[#allocation3 + $0x38] sm:$0xff] }
 0x8b7   : > { %1359 = vst [vmem:[#allocation3 + $0x48] sm:$0xf] %v1357_v34  ;;  %v1622_v5 = vpack.c.bf16 %v1368_v4, %v1366_v14 }
 0x8b9   : > { %1623 = vmatprep.subr.bf16.mxu1 %v1622_v5 }
 0x8ba   : > { %v1367_v6 = vld [vmem:[#allocation3 + $0x30] sm:$0xff] }
 0x8bb   : > { %v1624_v62 = vpack.c.bf16 %v1367_v6, %v1365_v2 }
 0x8bd   : > { %1625 = vmatpush1.bf16.msra.mxu1 %v1624_v62 }
 0x8be   : > { %v1370_v7 = vld [vmem:[#allocation3 + $0x48] sm:$0xf] }
 0x8bf   : > { %1600 = vmatprep.subr.msk.mxu1 %vm878_vm11, %v1370_v7 }
 0x8c1   : > { %1601 = vmatpush1.msk.msra.mxu1 %vm878_vm11, %v1369_v9 }
 0x8c2   : > { %1602 = vmatmul.mubr.msk.f32.vlgmr.msra.gmra.mrb[0].mxu1 %vm874_vm12, %v1360_v8 }
 0x8c5   : > { %v1375_v10 = vpop.permute.xlu0 %1374 }
 0x995   : > { %v1452_v11 = vpop.f32.mrb[0].mxu1 }
 0x996   : > { %v1453_v35 = vadd.f32 %v1452_v11, %v1375_v10  ;;  %v1454_v15 = vpop.f32.mrb[1].mxu1 }
 0x997   : > { %v1455_v16 = vadd.f32 %v1454_v15, %v1375_v10 }
 0x998   : > { %v1457_v18 = vadd.f32 %v1719_v17, %v1453_v35 }
 0x999   : > { %v1458_v19 = vadd.f32 %v1455_v16, %v2133_v1 }
 0x99b   : > { %v1461_v20 = vcombine.low %v1457_v18, %v1458_v19 }
 0x99d   : > { %1463 = vst [vmem:[%s400_s21] sm:$0xff] %v1461_v20 }
 0x99e   : > { %1820 = shalt.err (!%p1817_p7)
}
 0x99f   : > { %s1821_s5 = scalar_lea.hbm %s2596_s19, 128  ;;  %s1825_s28 = scalar_lea.hbm %s2650_s10, 256 }
 0x9a0   : > { %p1822_p10 = scmp.ne.s32.totalorder %s2596_s19, %s1821_s5  ;;  %p1826_p0 = scmp.lt.u32.totalorder %s2596_s19, %s2650_s10 }
 0x9a1   : > { %p1827_p11 = scmp.lt.u32.totalorder %s1825_s28, %s1821_s5  ;;  %p1829_p2 = scmp.lt.u32.totalorder %s1821_s5, %s2596_s19 }
 0x9a2   : > { %p1823_p13 = pnand %p1822_p10, %p2069_p6 }
 0x9a3   : > { %p1828_p9 = por %p1827_p11, %p1826_p0 }
 0x9a4   : > { %p1824_p5 = pneg %p1823_p13 }
 0x9a5   : > { %p1830_p1 = por %p1829_p2, %p1828_p9 }
 0x9a7   : > { %p1831_p4 = pnand %p1830_p1, %p1824_p5 }
 0x9a9   : > { %1834 = shalt.err (!%p1831_p4)
}
 0x9aa   : > { %1636 = dma.vmem_to_hbm [thread:$0]  (%p2069_p6), %s2598_s24, 128, %s2596_s19, %s1465_s18  }
 0x9ab PF: > { %s2727_s30 = sld [smem:[#allocation14_spill]]  ;;  %s1491_s25 = sand.u32 1, %s1865_s13  }
 0x9ac   : > { %p2729_p12 = scmp.ge.s32.totalorder %s1877_s16, 2  ;;  %s1492_s17 = scalar_lea.sflag [#allocation6], %s1491_s25 }
 0x9b1   : > { %p2728_p8 = scmp.ne.s32.totalorder %s2727_s30, 0 }
 0x9b3   : > { %p1650_p3 = pnand %p2729_p12, %p2728_p8 }
 0x9b5   : > { %1860 = dma.done.wait (!%p1650_p3), %s1492_s17, 128  }
 0x9b6   : > { %1862 = vsyncadd (!%p1650_p3), %s1492_s17, 4294967168  ;;  %p24_p7 = scmp.ge.s32.totalorder %s2006_s27, 4   ;;  %s2730_s13 = smov %s1869_s14 }
 0x9b7   : > { %s2731_s14 = smov %s1873_s15  ;;  %s2732_s15 = smov %s2065_s26 }
 0x9b8   : > { %s2733_s16 = smov %s2006_s27  ;;  %26 = sbr.rel (!%p24_p7) target bundleno = 8 (0x8), region = 121 }
 0x9bf   :  { %1497 = vsyncpa [#allocation5], 1 }
 0x9c0   :  { %1499 = vsyncpa [#allocation5 + $0x1], 1 }
 0x9c1   :  { %1500 = vsyncpa [#allocation8], 1 }
 0x9c2   :  { %1501 = vsyncpa [#allocation6], 1 }
 0x9c3   :  { %1503 = vsyncpa [#allocation6 + $0x1], 1 }

</bundles_post_ra>
